<compile_context>
chip_gen: v6e
topology: v6e:2x2x1
jax: 0.10.0
libtpu: 0.0.40
codegen_flags: <defaults>
</compile_context>

<pallas_src>
import functools

import jax
import jax.numpy as jnp
from jax import lax
from jax.experimental import pallas as pl
from jax.experimental.pallas import tpu as pltpu

_VMEM_LIMIT = 32 * 1024 * 1024   # <= physical VMEM on v5e/v6e (128 MiB) and v7x (64 MiB)


def _conv_stats_kernel(x_ref, w_ref, b_ref, y_ref, ssum_ref, ssq_ref, *,
                       kh, kw, stride, ho, wo):
    """Conv for one sample: in-VMEM im2col + MXU matmuls + bias + batch stats.

    x_ref   : (1, Hp, Wp, Cin)   bf16  padded NHWC input, one sample
    w_ref   : (kh*kw, Cin, Cout) bf16  conv weight, (dh, dw) major
    b_ref   : (1, Cout)          f32   conv bias
    y_ref   : (1, Ho*Wo, Cout)   bf16  conv output (pre-BN)
    ssum_ref, ssq_ref : (1, 1, Cout) f32  per-sample sum / sum-of-squares
    """
    cout = w_ref.shape[2]
    x = x_ref[0].astype(jnp.float32)                       # (Hp, Wp, Cin)

    acc = jnp.zeros((ho * wo, cout), jnp.float32)
    idx = 0
    for dh in range(kh):
        for dw in range(kw):
            # TODO(synk): stride > 1 relies on strided in-kernel slices; only
            # the stride == 1 path is exercised/verified here.
            win = x[dh:dh + (ho - 1) * stride + 1:stride,
                    dw:dw + (wo - 1) * stride + 1:stride, :]   # (Ho, Wo, Cin)
            win2d = win.reshape(ho * wo, -1).astype(jnp.bfloat16)
            acc = acc + jnp.dot(win2d, w_ref[idx],
                                preferred_element_type=jnp.float32)
            idx += 1

    y = acc + b_ref[...]                                   # (Ho*Wo, Cout) f32
    y_ref[...] = y.astype(y_ref.dtype)[None]
    ssum_ref[...] = jnp.sum(y, axis=0, keepdims=True)[None]
    ssq_ref[...] = jnp.sum(y * y, axis=0, keepdims=True)[None]


def _bn_relu_kernel(y_ref, scale_ref, shift_ref, o_ref):
    """out = relu(y * scale + shift); scale/shift broadcast over rows."""
    o_ref[...] = jnp.maximum(
        y_ref[...].astype(jnp.float32) * scale_ref[...] + shift_ref[...], 0.0)


def _pick_rows_per_step(total_rows, cap=1024):
    """Largest row-tile <= cap that evenly divides total_rows (prefer mult of 8)."""
    if total_rows <= cap:
        return total_rows
    for d in range(cap, 0, -1):
        if total_rows % d == 0 and d % 8 == 0:
            return d
    return total_rows


@functools.partial(jax.jit, static_argnames=("stride", "padding", "eps"))
def convolution_forward(x_nchw, weight, bias, gamma, beta, *,
                        stride=1, padding=1, eps=1e-5):
    """Forward of Convolution(cin, cout, k, stride, padding): conv + BN + ReLU."""
    x_nchw = x_nchw.astype(jnp.float32)
    N, Cin, H, W = x_nchw.shape
    Cout, _, kh, kw = weight.shape
    Ho = (H + 2 * padding - kh) // stride + 1
    Wo = (W + 2 * padding - kw) // stride + 1
    Hp, Wp = H + 2 * padding, W + 2 * padding
    M = N * Ho * Wo

    # glue: NCHW -> NHWC, zero-pad, bf16 (halves the HBM read of the input)
    x = jnp.transpose(x_nchw, (0, 2, 3, 1))
    xp = jnp.pad(x, ((0, 0), (padding, padding), (padding, padding), (0, 0)))
    xp = xp.astype(jnp.bfloat16)

    # weight OIHW -> (kh*kw, Cin, Cout) so per-offset slices are leading-dim indexed
    w3d = jnp.transpose(weight, (2, 3, 1, 0)).reshape(kh * kw, Cin, Cout)
    w3d = w3d.astype(jnp.bfloat16)
    b2d = bias.reshape(1, Cout).astype(jnp.float32)

    # ---- kernel 1: conv (in-kernel im2col, MXU) + per-sample batch stats ----
    # TODO(synk): one sample per grid step; very large H*W*Cin would need an
    # extra spatial tiling grid axis to bound per-step VMEM.
    kernel1 = functools.partial(_conv_stats_kernel, kh=kh, kw=kw,
                                stride=stride, ho=Ho, wo=Wo)
    y, ssum, ssq = pl.pallas_call(
        kernel1,
        out_shape=(jax.ShapeDtypeStruct((N, Ho * Wo, Cout), jnp.bfloat16),
                   jax.ShapeDtypeStruct((N, 1, Cout), jnp.float32),
                   jax.ShapeDtypeStruct((N, 1, Cout), jnp.float32)),
        grid_spec=pltpu.PrefetchScalarGridSpec(
            num_scalar_prefetch=0,
            grid=(N,),
            in_specs=[
                pl.BlockSpec((1, Hp, Wp, Cin), lambda n: (n, 0, 0, 0)),
                pl.BlockSpec((kh * kw, Cin, Cout), lambda n: (0, 0, 0)),
                pl.BlockSpec((1, Cout), lambda n: (0, 0)),
            ],
            out_specs=[
                pl.BlockSpec((1, Ho * Wo, Cout), lambda n: (n, 0, 0)),
                pl.BlockSpec((1, 1, Cout), lambda n: (n, 0, 0)),
                pl.BlockSpec((1, 1, Cout), lambda n: (n, 0, 0)),
            ],
        ),
        compiler_params=pltpu.CompilerParams(
            dimension_semantics=("parallel",),   # no resident accumulator -> safe
            vmem_limit_bytes=_VMEM_LIMIT),
    )(xp, w3d, b2d)

    # ---- tiny JAX glue: finalize BatchNorm batch statistics -----------------
    sum_c = jnp.sum(ssum, axis=(0, 1))                      # (Cout,)
    sq_c = jnp.sum(ssq, axis=(0, 1))
    mean = sum_c / M
    var = jnp.maximum(sq_c / M - mean * mean, 0.0)          # biased var (BN train)
    inv_std = lax.rsqrt(var + eps)
    scale = gamma.astype(jnp.float32) * inv_std
    shift = beta.astype(jnp.float32) - mean * scale

    # ---- kernel 2: BN affine + ReLU on a lane-dense view of y ---------------
    total = M * Cout
    if total % 128 == 0 and 128 % Cout == 0:
        lanes = 128
        rows = total // 128
        rep = 128 // Cout
        y_view = y.reshape(rows, lanes)          # contiguous -> free reshape
        scale_v = jnp.tile(scale, rep).reshape(1, lanes)
        shift_v = jnp.tile(shift, rep).reshape(1, lanes)
    else:
        lanes = Cout
        rows = M
        y_view = y.reshape(rows, lanes)
        scale_v = scale.reshape(1, lanes)
        shift_v = shift.reshape(1, lanes)

    tr = _pick_rows_per_step(rows)
    out_flat = pl.pallas_call(
        _bn_relu_kernel,
        out_shape=jax.ShapeDtypeStruct((rows, lanes), jnp.float32),
        grid_spec=pltpu.PrefetchScalarGridSpec(
            num_scalar_prefetch=0,
            grid=(rows // tr,),
            in_specs=[
                pl.BlockSpec((tr, lanes), lambda i: (i, 0)),
                pl.BlockSpec((1, lanes), lambda i: (0, 0)),
                pl.BlockSpec((1, lanes), lambda i: (0, 0)),
            ],
            out_specs=pl.BlockSpec((tr, lanes), lambda i: (i, 0)),
        ),
        compiler_params=pltpu.CompilerParams(
            dimension_semantics=("parallel",),
            vmem_limit_bytes=_VMEM_LIMIT),
    )(y_view, scale_v, shift_v)

    out = out_flat.reshape(N, Ho, Wo, Cout)
    return jnp.transpose(out, (0, 3, 1, 2))


def _reference(x, weight, bias, gamma, beta, *, stride, padding, eps=1e-5):
    """Pure-JAX f32 reference (conv + train-mode BN + ReLU)."""
    y = lax.conv_general_dilated(
        x, weight, window_strides=(stride, stride),
        padding=[(padding, padding), (padding, padding)],
        dimension_numbers=("NCHW", "OIHW", "NCHW"))
    y = y + bias.reshape(1, -1, 1, 1)
    mean = jnp.mean(y, axis=(0, 2, 3), keepdims=True)
    var = jnp.mean((y - mean) ** 2, axis=(0, 2, 3), keepdims=True)
    y = (y - mean) * lax.rsqrt(var + eps)
    y = y * gamma.reshape(1, -1, 1, 1) + beta.reshape(1, -1, 1, 1)
    return jnp.maximum(y, 0.0)


if __name__ == "__main__":
    # Convolution(cin=4, cout=8, kernel_size=3, step_size=1, padding=1)
    N, Cin, H, W = 2, 4, 16, 16
    Cout, ksize, stride, padding = 8, 3, 1, 1

    key = jax.random.PRNGKey(0)
    kx, kw_key, kb_key = jax.random.split(key, 3)
    x = jax.random.normal(kx, (N, Cin, H, W), dtype=jnp.float32)
    # deterministic synthetic parameters (no checkpoint loading)
    weight = jax.random.normal(kw_key, (Cout, Cin, ksize, ksize), jnp.float32) * 0.1
    bias = jax.random.normal(kb_key, (Cout,), jnp.float32) * 0.1
    gamma = jnp.ones((Cout,), jnp.float32)   # BatchNorm2d default weight
    beta = jnp.zeros((Cout,), jnp.float32)   # BatchNorm2d default bias

    out = convolution_forward(x, weight, bias, gamma, beta,
                              stride=stride, padding=padding)
    out = jax.block_until_ready(out)

    ref = _reference(x, weight, bias, gamma, beta, stride=stride, padding=padding)
    assert out.shape == (N, Cout, H, W), out.shape
    # bf16 MXU matmul + bf16 intermediate vs. an all-f32 XLA reference:
    # allow bf16-level rounding in the comparison.
    err = float(jnp.max(jnp.abs(out - ref)))
    assert err < 5e-2, err

    print("KERNEL_OK")
</pallas_src>

<mosaic_0001>
module attributes {stable_mosaic.version = 11 : i64} {
  func.func @_conv_stats_kernel(%arg0: i32, %arg1: memref<1x18x18x4xbf16, #tpu.memory_space<vmem>>, %arg2: memref<9x4x8xbf16, #tpu.memory_space<vmem>>, %arg3: memref<1x8xf32, #tpu.memory_space<vmem>>, %arg4: memref<1x256x8xbf16, #tpu.memory_space<vmem>>, %arg5: memref<1x1x8xf32, #tpu.memory_space<vmem>>, %arg6: memref<1x1x8xf32, #tpu.memory_space<vmem>>) attributes {dimension_semantics = [#tpu.dimension_semantics<parallel>], iteration_bounds = array<i64: 2>, scalar_prefetch = 0 : i64, scratch_operands = 0 : i64, tpu.core_type = #tpu.core_type<tc>, window_params = [{transform_indices = @transform_0, window_bounds = array<i64: 1, 18, 18, 4>}, {pipeline_mode = #tpu.pipeline_mode<synchronous>, transform_indices = @transform_1, window_bounds = array<i64: 9, 4, 8>}, {pipeline_mode = #tpu.pipeline_mode<synchronous>, transform_indices = @transform_2, window_bounds = array<i64: 1, 8>}, {transform_indices = @transform_3, window_bounds = array<i64: 1, 256, 8>}, {transform_indices = @transform_4, window_bounds = array<i64: 1, 1, 8>}, {transform_indices = @transform_5, window_bounds = array<i64: 1, 1, 8>}]} {
    %c0 = arith.constant 0 : index
    %c0_0 = arith.constant 0 : index
    %c0_1 = arith.constant 0 : index
    %c0_2 = arith.constant 0 : index
    %0 = vector.load %arg1[%c0, %c0_0, %c0_1, %c0_2] : memref<1x18x18x4xbf16, #tpu.memory_space<vmem>>, vector<1x18x18x4xbf16>
    %1 = vector.shape_cast %0 : vector<1x18x18x4xbf16> to vector<18x18x4xbf16>
    %2 = arith.extf %1 : vector<18x18x4xbf16> to vector<18x18x4xf32>
    %cst = arith.constant 0.000000e+00 : f32
    %3 = vector.broadcast %cst : f32 to vector<256x8xf32>
    %4 = vector.extract_strided_slice %2 {offsets = [0, 0, 0], sizes = [16, 16, 4], strides = [1, 1, 1]} : vector<18x18x4xf32> to vector<16x16x4xf32>
    %5 = vector.shape_cast %4 : vector<16x16x4xf32> to vector<256x4xf32>
    %6 = arith.truncf %5 : vector<256x4xf32> to vector<256x4xbf16>
    %c0_3 = arith.constant 0 : index
    %c0_4 = arith.constant 0 : index
    %c0_5 = arith.constant 0 : index
    %7 = vector.load %arg2[%c0_3, %c0_4, %c0_5] : memref<9x4x8xbf16, #tpu.memory_space<vmem>>, vector<1x4x8xbf16>
    %8 = vector.shape_cast %7 : vector<1x4x8xbf16> to vector<4x8xbf16>
    %cst_6 = arith.constant dense<0.000000e+00> : vector<256x8xf32>
    %9 = tpu.matmul %6, %8, %cst_6 {dimension_numbers = #tpu.dot_dimension_numbers<[1], [0], [0], [1], [0, 0, 1, 1], [], []>} : vector<256x4xbf16>, vector<4x8xbf16>, vector<256x8xf32> -> vector<256x8xf32>
    %10 = arith.addf %3, %9 : vector<256x8xf32>
    %11 = vector.extract_strided_slice %2 {offsets = [0, 1, 0], sizes = [16, 16, 4], strides = [1, 1, 1]} : vector<18x18x4xf32> to vector<16x16x4xf32>
    %12 = vector.shape_cast %11 : vector<16x16x4xf32> to vector<256x4xf32>
    %13 = arith.truncf %12 : vector<256x4xf32> to vector<256x4xbf16>
    %c1 = arith.constant 1 : index
    %c0_7 = arith.constant 0 : index
    %c0_8 = arith.constant 0 : index
    %14 = vector.load %arg2[%c1, %c0_7, %c0_8] : memref<9x4x8xbf16, #tpu.memory_space<vmem>>, vector<1x4x8xbf16>
    %15 = vector.shape_cast %14 : vector<1x4x8xbf16> to vector<4x8xbf16>
    %cst_9 = arith.constant dense<0.000000e+00> : vector<256x8xf32>
    %16 = tpu.matmul %13, %15, %cst_9 {dimension_numbers = #tpu.dot_dimension_numbers<[1], [0], [0], [1], [0, 0, 1, 1], [], []>} : vector<256x4xbf16>, vector<4x8xbf16>, vector<256x8xf32> -> vector<256x8xf32>
    %17 = arith.addf %10, %16 : vector<256x8xf32>
    %18 = vector.extract_strided_slice %2 {offsets = [0, 2, 0], sizes = [16, 16, 4], strides = [1, 1, 1]} : vector<18x18x4xf32> to vector<16x16x4xf32>
    %19 = vector.shape_cast %18 : vector<16x16x4xf32> to vector<256x4xf32>
    %20 = arith.truncf %19 : vector<256x4xf32> to vector<256x4xbf16>
    %c2 = arith.constant 2 : index
    %c0_10 = arith.constant 0 : index
    %c0_11 = arith.constant 0 : index
    %21 = vector.load %arg2[%c2, %c0_10, %c0_11] : memref<9x4x8xbf16, #tpu.memory_space<vmem>>, vector<1x4x8xbf16>
    %22 = vector.shape_cast %21 : vector<1x4x8xbf16> to vector<4x8xbf16>
    %cst_12 = arith.constant dense<0.000000e+00> : vector<256x8xf32>
    %23 = tpu.matmul %20, %22, %cst_12 {dimension_numbers = #tpu.dot_dimension_numbers<[1], [0], [0], [1], [0, 0, 1, 1], [], []>} : vector<256x4xbf16>, vector<4x8xbf16>, vector<256x8xf32> -> vector<256x8xf32>
    %24 = arith.addf %17, %23 : vector<256x8xf32>
    %25 = vector.extract_strided_slice %2 {offsets = [1, 0, 0], sizes = [16, 16, 4], strides = [1, 1, 1]} : vector<18x18x4xf32> to vector<16x16x4xf32>
    %26 = vector.shape_cast %25 : vector<16x16x4xf32> to vector<256x4xf32>
    %27 = arith.truncf %26 : vector<256x4xf32> to vector<256x4xbf16>
    %c3 = arith.constant 3 : index
    %c0_13 = arith.constant 0 : index
    %c0_14 = arith.constant 0 : index
    %28 = vector.load %arg2[%c3, %c0_13, %c0_14] : memref<9x4x8xbf16, #tpu.memory_space<vmem>>, vector<1x4x8xbf16>
    %29 = vector.shape_cast %28 : vector<1x4x8xbf16> to vector<4x8xbf16>
    %cst_15 = arith.constant dense<0.000000e+00> : vector<256x8xf32>
    %30 = tpu.matmul %27, %29, %cst_15 {dimension_numbers = #tpu.dot_dimension_numbers<[1], [0], [0], [1], [0, 0, 1, 1], [], []>} : vector<256x4xbf16>, vector<4x8xbf16>, vector<256x8xf32> -> vector<256x8xf32>
    %31 = arith.addf %24, %30 : vector<256x8xf32>
    %32 = vector.extract_strided_slice %2 {offsets = [1, 1, 0], sizes = [16, 16, 4], strides = [1, 1, 1]} : vector<18x18x4xf32> to vector<16x16x4xf32>
    %33 = vector.shape_cast %32 : vector<16x16x4xf32> to vector<256x4xf32>
    %34 = arith.truncf %33 : vector<256x4xf32> to vector<256x4xbf16>
    %c4 = arith.constant 4 : index
    %c0_16 = arith.constant 0 : index
    %c0_17 = arith.constant 0 : index
    %35 = vector.load %arg2[%c4, %c0_16, %c0_17] : memref<9x4x8xbf16, #tpu.memory_space<vmem>>, vector<1x4x8xbf16>
    %36 = vector.shape_cast %35 : vector<1x4x8xbf16> to vector<4x8xbf16>
    %cst_18 = arith.constant dense<0.000000e+00> : vector<256x8xf32>
    %37 = tpu.matmul %34, %36, %cst_18 {dimension_numbers = #tpu.dot_dimension_numbers<[1], [0], [0], [1], [0, 0, 1, 1], [], []>} : vector<256x4xbf16>, vector<4x8xbf16>, vector<256x8xf32> -> vector<256x8xf32>
    %38 = arith.addf %31, %37 : vector<256x8xf32>
    %39 = vector.extract_strided_slice %2 {offsets = [1, 2, 0], sizes = [16, 16, 4], strides = [1, 1, 1]} : vector<18x18x4xf32> to vector<16x16x4xf32>
    %40 = vector.shape_cast %39 : vector<16x16x4xf32> to vector<256x4xf32>
    %41 = arith.truncf %40 : vector<256x4xf32> to vector<256x4xbf16>
    %c5 = arith.constant 5 : index
    %c0_19 = arith.constant 0 : index
    %c0_20 = arith.constant 0 : index
    %42 = vector.load %arg2[%c5, %c0_19, %c0_20] : memref<9x4x8xbf16, #tpu.memory_space<vmem>>, vector<1x4x8xbf16>
    %43 = vector.shape_cast %42 : vector<1x4x8xbf16> to vector<4x8xbf16>
    %cst_21 = arith.constant dense<0.000000e+00> : vector<256x8xf32>
    %44 = tpu.matmul %41, %43, %cst_21 {dimension_numbers = #tpu.dot_dimension_numbers<[1], [0], [0], [1], [0, 0, 1, 1], [], []>} : vector<256x4xbf16>, vector<4x8xbf16>, vector<256x8xf32> -> vector<256x8xf32>
    %45 = arith.addf %38, %44 : vector<256x8xf32>
    %46 = vector.extract_strided_slice %2 {offsets = [2, 0, 0], sizes = [16, 16, 4], strides = [1, 1, 1]} : vector<18x18x4xf32> to vector<16x16x4xf32>
    %47 = vector.shape_cast %46 : vector<16x16x4xf32> to vector<256x4xf32>
    %48 = arith.truncf %47 : vector<256x4xf32> to vector<256x4xbf16>
    %c6 = arith.constant 6 : index
    %c0_22 = arith.constant 0 : index
    %c0_23 = arith.constant 0 : index
    %49 = vector.load %arg2[%c6, %c0_22, %c0_23] : memref<9x4x8xbf16, #tpu.memory_space<vmem>>, vector<1x4x8xbf16>
    %50 = vector.shape_cast %49 : vector<1x4x8xbf16> to vector<4x8xbf16>
    %cst_24 = arith.constant dense<0.000000e+00> : vector<256x8xf32>
    %51 = tpu.matmul %48, %50, %cst_24 {dimension_numbers = #tpu.dot_dimension_numbers<[1], [0], [0], [1], [0, 0, 1, 1], [], []>} : vector<256x4xbf16>, vector<4x8xbf16>, vector<256x8xf32> -> vector<256x8xf32>
    %52 = arith.addf %45, %51 : vector<256x8xf32>
    %53 = vector.extract_strided_slice %2 {offsets = [2, 1, 0], sizes = [16, 16, 4], strides = [1, 1, 1]} : vector<18x18x4xf32> to vector<16x16x4xf32>
    %54 = vector.shape_cast %53 : vector<16x16x4xf32> to vector<256x4xf32>
    %55 = arith.truncf %54 : vector<256x4xf32> to vector<256x4xbf16>
    %c7 = arith.constant 7 : index
    %c0_25 = arith.constant 0 : index
    %c0_26 = arith.constant 0 : index
    %56 = vector.load %arg2[%c7, %c0_25, %c0_26] : memref<9x4x8xbf16, #tpu.memory_space<vmem>>, vector<1x4x8xbf16>
    %57 = vector.shape_cast %56 : vector<1x4x8xbf16> to vector<4x8xbf16>
    %cst_27 = arith.constant dense<0.000000e+00> : vector<256x8xf32>
    %58 = tpu.matmul %55, %57, %cst_27 {dimension_numbers = #tpu.dot_dimension_numbers<[1], [0], [0], [1], [0, 0, 1, 1], [], []>} : vector<256x4xbf16>, vector<4x8xbf16>, vector<256x8xf32> -> vector<256x8xf32>
    %59 = arith.addf %52, %58 : vector<256x8xf32>
    %60 = vector.extract_strided_slice %2 {offsets = [2, 2, 0], sizes = [16, 16, 4], strides = [1, 1, 1]} : vector<18x18x4xf32> to vector<16x16x4xf32>
    %61 = vector.shape_cast %60 : vector<16x16x4xf32> to vector<256x4xf32>
    %62 = arith.truncf %61 : vector<256x4xf32> to vector<256x4xbf16>
    %c8 = arith.constant 8 : index
    %c0_28 = arith.constant 0 : index
    %c0_29 = arith.constant 0 : index
    %63 = vector.load %arg2[%c8, %c0_28, %c0_29] : memref<9x4x8xbf16, #tpu.memory_space<vmem>>, vector<1x4x8xbf16>
    %64 = vector.shape_cast %63 : vector<1x4x8xbf16> to vector<4x8xbf16>
    %cst_30 = arith.constant dense<0.000000e+00> : vector<256x8xf32>
    %65 = tpu.matmul %62, %64, %cst_30 {dimension_numbers = #tpu.dot_dimension_numbers<[1], [0], [0], [1], [0, 0, 1, 1], [], []>} : vector<256x4xbf16>, vector<4x8xbf16>, vector<256x8xf32> -> vector<256x8xf32>
    %66 = arith.addf %59, %65 : vector<256x8xf32>
    %c0_31 = arith.constant 0 : index
    %c0_32 = arith.constant 0 : index
    %67 = vector.load %arg3[%c0_31, %c0_32] : memref<1x8xf32, #tpu.memory_space<vmem>>, vector<1x8xf32>
    %68 = vector.broadcast %67 : vector<1x8xf32> to vector<256x8xf32>
    %69 = arith.addf %66, %68 : vector<256x8xf32>
    %70 = arith.truncf %69 : vector<256x8xf32> to vector<256x8xbf16>
    %71 = vector.shape_cast %70 : vector<256x8xbf16> to vector<1x256x8xbf16>
    %c0_33 = arith.constant 0 : index
    %c0_34 = arith.constant 0 : index
    %c0_35 = arith.constant 0 : index
    %72 = vector.load %arg4[%c0_33, %c0_34, %c0_35] : memref<1x256x8xbf16, #tpu.memory_space<vmem>>, vector<1x256x8xbf16>
    tpu.vector_store %arg4[%c0_33, %c0_34, %c0_35], %71 {strides = array<i32>} : memref<1x256x8xbf16, #tpu.memory_space<vmem>>, vector<1x256x8xbf16>,
    %cst_36 = arith.constant dense<0.000000e+00> : vector<8xf32>
    %73 = vector.multi_reduction <add>, %69, %cst_36 [0] : vector<256x8xf32> to vector<8xf32>
    %74 = vector.shape_cast %73 : vector<8xf32> to vector<1x8xf32>
    %75 = vector.shape_cast %74 : vector<1x8xf32> to vector<1x1x8xf32>
    %c0_37 = arith.constant 0 : index
    %c0_38 = arith.constant 0 : index
    %c0_39 = arith.constant 0 : index
    %76 = vector.load %arg5[%c0_37, %c0_38, %c0_39] : memref<1x1x8xf32, #tpu.memory_space<vmem>>, vector<1x1x8xf32>
    tpu.vector_store %arg5[%c0_37, %c0_38, %c0_39], %75 {strides = array<i32>} : memref<1x1x8xf32, #tpu.memory_space<vmem>>, vector<1x1x8xf32>,
    %77 = arith.mulf %69, %69 : vector<256x8xf32>
    %cst_40 = arith.constant dense<0.000000e+00> : vector<8xf32>
    %78 = vector.multi_reduction <add>, %77, %cst_40 [0] : vector<256x8xf32> to vector<8xf32>
    %79 = vector.shape_cast %78 : vector<8xf32> to vector<1x8xf32>
    %80 = vector.shape_cast %79 : vector<1x8xf32> to vector<1x1x8xf32>
    %c0_41 = arith.constant 0 : index
    %c0_42 = arith.constant 0 : index
    %c0_43 = arith.constant 0 : index
    %81 = vector.load %arg6[%c0_41, %c0_42, %c0_43] : memref<1x1x8xf32, #tpu.memory_space<vmem>>, vector<1x1x8xf32>
    tpu.vector_store %arg6[%c0_41, %c0_42, %c0_43], %80 {strides = array<i32>} : memref<1x1x8xf32, #tpu.memory_space<vmem>>, vector<1x1x8xf32>,
    return
  }
  func.func @transform_0(%arg0: i32) -> (i32, i32, i32, i32) {
    %c0_i32 = arith.constant 0 : i32
    %c0_i32_0 = arith.constant 0 : i32
    %c0_i32_1 = arith.constant 0 : i32
    %c0_i32_2 = arith.constant 0 : i32
    return %arg0, %c0_i32, %c0_i32_0, %c0_i32_1 : i32, i32, i32, i32
  }
  func.func @transform_1(%arg0: i32) -> (i32, i32, i32) {
    %c0_i32 = arith.constant 0 : i32
    %c0_i32_0 = arith.constant 0 : i32
    %c0_i32_1 = arith.constant 0 : i32
    %c0_i32_2 = arith.constant 0 : i32
    return %c0_i32, %c0_i32_0, %c0_i32_1 : i32, i32, i32
  }
  func.func @transform_2(%arg0: i32) -> (i32, i32) {
    %c0_i32 = arith.constant 0 : i32
    %c0_i32_0 = arith.constant 0 : i32
    %c0_i32_1 = arith.constant 0 : i32
    return %c0_i32, %c0_i32_0 : i32, i32
  }
  func.func @transform_3(%arg0: i32) -> (i32, i32, i32) {
    %c0_i32 = arith.constant 0 : i32
    %c0_i32_0 = arith.constant 0 : i32
    %c0_i32_1 = arith.constant 0 : i32
    return %arg0, %c0_i32, %c0_i32_0 : i32, i32, i32
  }
  func.func @transform_4(%arg0: i32) -> (i32, i32, i32) {
    %c0_i32 = arith.constant 0 : i32
    %c0_i32_0 = arith.constant 0 : i32
    %c0_i32_1 = arith.constant 0 : i32
    return %arg0, %c0_i32, %c0_i32_0 : i32, i32, i32
  }
  func.func @transform_5(%arg0: i32) -> (i32, i32, i32) {
    %c0_i32 = arith.constant 0 : i32
    %c0_i32_0 = arith.constant 0 : i32
    %c0_i32_1 = arith.constant 0 : i32
    return %arg0, %c0_i32, %c0_i32_0 : i32, i32, i32
  }
}

module attributes {stable_mosaic.version = 11 : i64} {
  func.func @_bn_relu_kernel(%arg0: i32, %arg1: memref<32x128xbf16, #tpu.memory_space<vmem>>, %arg2: memref<1x128xf32, #tpu.memory_space<vmem>>, %arg3: memref<1x128xf32, #tpu.memory_space<vmem>>, %arg4: memref<32x128xf32, #tpu.memory_space<vmem>>) attributes {dimension_semantics = [#tpu.dimension_semantics<parallel>], iteration_bounds = array<i64: 1>, scalar_prefetch = 0 : i64, scratch_operands = 0 : i64, tpu.core_type = #tpu.core_type<tc>, window_params = [{transform_indices = @transform_0, window_bounds = array<i64: 32, 128>}, {pipeline_mode = #tpu.pipeline_mode<synchronous>, transform_indices = @transform_1, window_bounds = array<i64: 1, 128>}, {pipeline_mode = #tpu.pipeline_mode<synchronous>, transform_indices = @transform_2, window_bounds = array<i64: 1, 128>}, {transform_indices = @transform_3, window_bounds = array<i64: 32, 128>}]} {
    %c0 = arith.constant 0 : index
    %c0_0 = arith.constant 0 : index
    %0 = vector.load %arg1[%c0, %c0_0] : memref<32x128xbf16, #tpu.memory_space<vmem>>, vector<32x128xbf16>
    %1 = arith.extf %0 : vector<32x128xbf16> to vector<32x128xf32>
    %c0_1 = arith.constant 0 : index
    %c0_2 = arith.constant 0 : index
    %2 = vector.load %arg2[%c0_1, %c0_2] : memref<1x128xf32, #tpu.memory_space<vmem>>, vector<1x128xf32>
    %3 = vector.broadcast %2 : vector<1x128xf32> to vector<32x128xf32>
    %4 = arith.mulf %1, %3 : vector<32x128xf32>
    %c0_3 = arith.constant 0 : index
    %c0_4 = arith.constant 0 : index
    %5 = vector.load %arg3[%c0_3, %c0_4] : memref<1x128xf32, #tpu.memory_space<vmem>>, vector<1x128xf32>
    %6 = vector.broadcast %5 : vector<1x128xf32> to vector<32x128xf32>
    %7 = arith.addf %4, %6 : vector<32x128xf32>
    %cst = arith.constant 0.000000e+00 : f32
    %8 = vector.broadcast %cst : f32 to vector<32x128xf32>
    %9 = arith.maximumf %7, %8 : vector<32x128xf32>
    %c0_5 = arith.constant 0 : index
    %c0_6 = arith.constant 0 : index
    %10 = vector.load %arg4[%c0_5, %c0_6] : memref<32x128xf32, #tpu.memory_space<vmem>>, vector<32x128xf32>
    tpu.vector_store %arg4[%c0_5, %c0_6], %9 {strides = array<i32>} : memref<32x128xf32, #tpu.memory_space<vmem>>, vector<32x128xf32>,
    return
  }
  func.func @transform_0(%arg0: i32) -> (i32, i32) {
    %c0_i32 = arith.constant 0 : i32
    %c0_i32_0 = arith.constant 0 : i32
    return %arg0, %c0_i32 : i32, i32
  }
  func.func @transform_1(%arg0: i32) -> (i32, i32) {
    %c0_i32 = arith.constant 0 : i32
    %c0_i32_0 = arith.constant 0 : i32
    %c0_i32_1 = arith.constant 0 : i32
    return %c0_i32, %c0_i32_0 : i32, i32
  }
  func.func @transform_2(%arg0: i32) -> (i32, i32) {
    %c0_i32 = arith.constant 0 : i32
    %c0_i32_0 = arith.constant 0 : i32
    %c0_i32_1 = arith.constant 0 : i32
    return %c0_i32, %c0_i32_0 : i32, i32
  }
  func.func @transform_3(%arg0: i32) -> (i32, i32) {
    %c0_i32 = arith.constant 0 : i32
    %c0_i32_0 = arith.constant 0 : i32
    return %arg0, %c0_i32 : i32, i32
  }
}

</mosaic_0001>

<bundles_post_ra>
// kernel: tile.18
= control target key start
LH: loop header
LB: loop body
LE: loop exit
PB: predicated region body
PF: predicated region fallthrough
CT: control target
= control target key end

     0   :  { %s28_s0 = inlined_call_operand.vmem [shape: f32[8], index: 0, kind: input, shape index: {}]   ;;  %s29_s1 = inlined_call_operand.vmem [shape: f32[16,8], index: 1, kind: output, shape index: {}]  }
   0x1   :  { %v4_v0 = vld [vmem:[%s28_s0] ss:$0 sm:$0xff] }
   0x2   :  { %5 = vst [vmem:[%s29_s1] sm:$0xff] %v4_v0  ;;  %8 = vst [vmem:[%s29_s1 + $0x8] sm:$0xff] %v4_v0 }

// kernel: tile.19
= control target key start
LH: loop header
LB: loop body
LE: loop exit
PB: predicated region body
PF: predicated region fallthrough
CT: control target
= control target key end

     0   :  { %s133_s10 = smov 120   ;;  %s134_s11 = smov 104   ;;  %vm3_vm0 = vcmask 64512   ;;  %vm9_vm1 = vcmask 1048512   ;;  %vm15_vm2 = vcmask 982912   ;;  %vm21_vm3 = vcmask 917312   ;;  %s209_s0 = inlined_call_operand.vmem [shape: f32[16,8], index: 0, kind: input, shape index: {}]   ;;  %s210_s1 = inlined_call_operand.vmem [shape: f32[1,128], index: 1, kind: output, shape index: {}]  }
   0x1   :  { %v103_v0 = vld [vmem:[%s209_s0 + $0xf] sm:$0x1]   ;;  %v105_v1 = vld [vmem:[%s209_s0 + $0xd] sm:$0x1]   ;;  %v104_v2 = vld [vmem:[%s209_s0 + $0xe] sm:$0x1]  }
   0x2   :  { %7 = vrot.lane.b32.xlu0 %v103_v0, %s133_s10  ;;  %19 = vrot.lane.b32.xlu1 %v105_v1, %s134_s11  ;;  %v106_v3 = vld [vmem:[%s209_s0 + $0xc] sm:$0x1]   ;;  %s135_s16 = smov 112   ;;  %s136_s17 = smov 96   ;;  %v107_v4 = vld [vmem:[%s209_s0 + $0xb] sm:$0x1]  }
   0x3   :  { %v108_v5 = vld [vmem:[%s209_s0 + $0xa] sm:$0x1]   ;;  %v2_v6 = vld [vmem:[%s209_s0] sm:$0x1]   ;;  %s137_s24 = smov 88   ;;  %s138_s25 = smov 80  }
   0x4   :  { %4 = vst.msk [vmem:[#allocation0] sm:$0x1] %vm3_vm0, %v2_v6   ;;  %v109_v7 = vld [vmem:[%s209_s0 + $0x9] sm:$0x1]   ;;  %v110_v8 = vld [vmem:[%s209_s0 + $0x8] sm:$0x1]  }
   0x5   :  { %s139_s30 = smov 72   ;;  %s140_s2 = smov 64   ;;  %v111_v9 = vld [vmem:[%s209_s0 + $0x7] sm:$0x1]   ;;  %v112_v10 = vld [vmem:[%s209_s0 + $0x6] sm:$0x1]  }
   0x6   :  { %13 = vrot.lane.b32.xlu0 %v104_v2, %s135_s16  ;;  %25 = vrot.lane.b32.xlu1 %v106_v3, %s136_s17  ;;  %s141_s7 = smov 56   ;;  %s142_s8 = smov 48   ;;  %v113_v11 = vld [vmem:[%s209_s0 + $0x5] sm:$0x1]   ;;  %v114_v12 = vld [vmem:[%s209_s0 + $0x4] sm:$0x1]  }
   0x7   :  { %s143_s13 = smov 40   ;;  %s144_s14 = smov 32   ;;  %v115_v13 = vld [vmem:[%s209_s0 + $0x3] sm:$0x1]   ;;  %v116_v14 = vld [vmem:[%s209_s0 + $0x2] sm:$0x1]  }
   0x8   :  { %s145_s19 = smov 24   ;;  %s146_s20 = smov 16   ;;  %v117_v15 = vld [vmem:[%s209_s0 + $0x1] sm:$0x1]   ;;  %vm27_vm4 = vcmask 851712   ;;  %vm33_vm5 = vcmask 786112  }
   0x9   :  { %s147_s0 = smov 8   ;;  %vm39_vm6 = vcmask 720512   ;;  %vm45_vm7 = vcmask 654912   ;;  %vm51_vm8 = vcmask 589312   ;;  %vm57_vm9 = vcmask 523712  }
   0xa   :  { %31 = vrot.lane.b32.xlu0 %v107_v4, %s137_s24  ;;  %37 = vrot.lane.b32.xlu1 %v108_v5, %s138_s25  ;;  %vm63_vm10 = vcmask 458112   ;;  %vm69_vm11 = vcmask 392512   ;;  %vm75_vm12 = vcmask 326912   ;;  %vm81_vm13 = vcmask 261312  }
   0xb   :  { %vm87_vm14 = vcmask 195712   ;;  %vm93_vm15 = vcmask 130112  }
   0xe   :  { %43 = vrot.lane.b32.xlu0 %v109_v7, %s139_s30  ;;  %49 = vrot.lane.b32.xlu1 %v110_v8, %s140_s2 }
  0x12   :  { %55 = vrot.lane.b32.xlu0 %v111_v9, %s141_s7  ;;  %61 = vrot.lane.b32.xlu1 %v112_v10, %s142_s8 }
  0x16   :  { %67 = vrot.lane.b32.xlu0 %v113_v11, %s143_s13  ;;  %73 = vrot.lane.b32.xlu1 %v114_v12, %s144_s14 }
  0x1a   :  { %79 = vrot.lane.b32.xlu0 %v115_v13, %s145_s19  ;;  %85 = vrot.lane.b32.xlu1 %v116_v14, %s146_s20 }
  0x1e   :  { %91 = vrot.lane.b32.xlu0 %v117_v15, %s147_s0 }
  0x74   :  { %v8_v16 = vpop.permute.xlu0 %7   ;;  %v20_v17 = vpop.permute.xlu1 %19  }
  0x75   :  { %10 = vst.msk [vmem:[#allocation0] sm:$0x1] %vm9_vm1, %v8_v16  }
  0x78   :  { %v14_v18 = vpop.permute.xlu0 %13   ;;  %v26_v19 = vpop.permute.xlu1 %25  }
  0x79   :  { %16 = vst.msk [vmem:[#allocation0] sm:$0x1] %vm15_vm2, %v14_v18  }
  0x7a   :  { %22 = vst.msk [vmem:[#allocation0] sm:$0x1] %vm21_vm3, %v20_v17  }
  0x7b   :  { %28 = vst.msk [vmem:[#allocation0] sm:$0x1] %vm27_vm4, %v26_v19  }
  0x7c   :  { %v32_v20 = vpop.permute.xlu0 %31   ;;  %v38_v21 = vpop.permute.xlu1 %37  }
  0x7d   :  { %34 = vst.msk [vmem:[#allocation0] sm:$0x1] %vm33_vm5, %v32_v20  }
  0x7e   :  { %40 = vst.msk [vmem:[#allocation0] sm:$0x1] %vm39_vm6, %v38_v21  }
  0x80   :  { %v44_v22 = vpop.permute.xlu0 %43   ;;  %v50_v23 = vpop.permute.xlu1 %49  }
  0x81   :  { %46 = vst.msk [vmem:[#allocation0] sm:$0x1] %vm45_vm7, %v44_v22  }
  0x82   :  { %52 = vst.msk [vmem:[#allocation0] sm:$0x1] %vm51_vm8, %v50_v23  }
  0x84   :  { %v56_v24 = vpop.permute.xlu0 %55   ;;  %v62_v25 = vpop.permute.xlu1 %61  }
  0x85   :  { %58 = vst.msk [vmem:[#allocation0] sm:$0x1] %vm57_vm9, %v56_v24  }
  0x86   :  { %64 = vst.msk [vmem:[#allocation0] sm:$0x1] %vm63_vm10, %v62_v25  }
  0x88   :  { %v68_v26 = vpop.permute.xlu0 %67   ;;  %v74_v27 = vpop.permute.xlu1 %73  }
  0x89   :  { %70 = vst.msk [vmem:[#allocation0] sm:$0x1] %vm69_vm11, %v68_v26  }
  0x8a   :  { %76 = vst.msk [vmem:[#allocation0] sm:$0x1] %vm75_vm12, %v74_v27  }
  0x8c   :  { %v80_v28 = vpop.permute.xlu0 %79   ;;  %v86_v29 = vpop.permute.xlu1 %85  }
  0x8d   :  { %82 = vst.msk [vmem:[#allocation0] sm:$0x1] %vm81_vm13, %v80_v28  }
  0x8e   :  { %88 = vst.msk [vmem:[#allocation0] sm:$0x1] %vm87_vm14, %v86_v29  }
  0x90   :  { %v92_v30 = vpop.permute.xlu0 %91  }
  0x91   :  { %94 = vst.msk [vmem:[#allocation0] sm:$0x1] %vm93_vm15, %v92_v30  }
  0x98   :  { %v99_v31 = vld [vmem:[#allocation0] sm:$0x1] }
  0x99   :  { %102 = vst [vmem:[%s210_s1] sm:$0x1] %v99_v31 }

// kernel: convolution_forward.3
= control target key start
LH: loop header
LB: loop body
LE: loop exit
PB: predicated region body
PF: predicated region fallthrough
CT: control target
= control target key end

     0   :  { %s111_s0 = inlined_call_operand.vmem [shape: bf16[32,128], index: 0, kind: input, shape index: {}]   ;;  %s112_s1 = inlined_call_operand.vmem [shape: f32[1,128], index: 1, kind: input, shape index: {}]   ;;  %s113_s2 = inlined_call_operand.vmem [shape: f32[1,128], index: 2, kind: input, shape index: {}]   ;;  %s114_s3 = inlined_call_operand.vmem [shape: f32[32,128], index: 3, kind: output, shape index: {}]  }
   0x1   :  { %v59_v0 = vld [vmem:[%s111_s0] sm:$0xff]   ;;  %v66_v4 = vld [vmem:[%s111_s0 + $0x8] sm:$0xff]  }
   0x2   :  { %v56_v1 = vld [vmem:[%s112_s1] ss:$0 sm:$0xff]  ;;  %v60_v2 = vunpack.c.l.bf16 %v59_v0  ;;  %v61_v3 = vunpack.c.h.bf16 %v59_v0  ;;  %v64_v6 = vunpack.c.l.bf16 %v66_v4  ;;  %v65_v7 = vunpack.c.h.bf16 %v66_v4 }
   0x3   :  { %v57_v5 = vld [vmem:[%s113_s2] ss:$0 sm:$0xff] }
   0x4   :  { %v29_v8 = vmul.f32 %v60_v2, %v56_v1  ;;  %v30_v9 = vmul.f32 %v61_v3, %v56_v1  ;;  %v31_v10 = vmul.f32 %v64_v6, %v56_v1  ;;  %v32_v11 = vmul.f32 %v65_v7, %v56_v1 }
   0x6   :  { %v40_v12 = vadd.f32 %v57_v5, %v29_v8  ;;  %v41_v13 = vadd.f32 %v57_v5, %v30_v9  ;;  %v42_v14 = vadd.f32 %v57_v5, %v31_v10  ;;  %v43_v15 = vadd.f32 %v57_v5, %v32_v11 }
   0x8   :  { %v44_v16 = vmax.f32 %v40_v12, 0.0  ;;  %v45_v17 = vmax.f32 %v41_v13, 0.0  ;;  %v46_v18 = vmax.f32 %v42_v14, 0.0  ;;  %v47_v19 = vmax.f32 %v43_v15, 0.0 }
   0xa   :  { %48 = vst [vmem:[%s114_s3] sm:$0xff] %v44_v16  ;;  %49 = vst [vmem:[%s114_s3 + $0x8] sm:$0xff] %v45_v17 }
   0xb   :  { %50 = vst [vmem:[%s114_s3 + $0x10] sm:$0xff] %v46_v18  ;;  %51 = vst [vmem:[%s114_s3 + $0x18] sm:$0xff] %v47_v19 }

// kernel: convolution_forward.2
= control target key start
LH: loop header
LB: loop body
LE: loop exit
PB: predicated region body
PF: predicated region fallthrough
CT: control target
= control target key end

     0   :  { %s3873_s18 = smov 0   ;;  %s5309_s0 = inlined_call_operand.vmem [shape: bf16[2,18,18,4], index: 0, kind: input, shape index: {}]   ;;  %s5310_s1 = inlined_call_operand.vmem [shape: bf16[9,4,8], index: 1, kind: input, shape index: {}]   ;;  %s5311_s2 = inlined_call_operand.vmem [shape: f32[1,8], index: 2, kind: input, shape index: {}]   ;;  %s5312_s3 = inlined_call_operand.vmem [shape: bf16[2,256,8], index: 3, kind: output, shape index: {0}]   ;;  %s5313_s4 = inlined_call_operand.vmem [shape: f32[2,1,8], index: 4, kind: output, shape index: {1}]   ;;  %s5314_s5 = inlined_call_operand.vmem [shape: f32[2,1,8], index: 5, kind: output, shape index: {2}]  }
   0x1 LB: > { %s3073_s19 = sadd.s32 4294967295, %s3841_s18   ;;  %p3077_p0 = scmp.ge.s32.totalorder %s3841_s18, 1  ;;  %s3841_s18 = sphi %s3873_s18, %s16_s18  }
   0x2   : > { %p192_p1 = scmp.lt.s32.totalorder %s3841_s18, 3 }
   0x4   : > { %p193_p2 = pnand %p3077_p0, %p192_p1 }
   0x6   : > { %196 = sbr.rel (%p193_p2) target bundleno = 548 (0x224), region = 32 }
   0xb   : > { %v3097_v0 = vld [vmem:[%s5310_s1 + $0x2] sm:$0x3]  ;;  %vm596_vm0 = vcmask 1041408   ;;  %p226_p3 = scmp.lt.s32.totalorder %s3073_s19, 1  ;;  %v367_v2 = vld [vmem:[%s5310_s1] sm:$0x3] }
   0xc   : > { %3781 = vmatprep.subr.msk.bf16.mxu1 %vm596_vm0, %v3097_v0  ;;  %3780 = vmatprep.subr.msk.bf16.mxu0 %vm596_vm0, %v3097_v0  ;;  %v598_v1 = vsel %vm596_vm0, %v3097_v0, 0  ;;  %v3130_v3 = vld [vmem:[%s5310_s1 + $0x4] sm:$0x3]  ;;  %vm416_vm1 = vcmask 1046528   ;;  %vm547_vm2 = vcmask 31744   ;;  %v3926_v17 = vsel %vm596_vm0, %v367_v2, 0 }
   0xd   : > { %3779 = vmatpush3.bf16.msra.mxu1 %v598_v1  ;;  %3473 = vmatpush3.bf16.msra.mxu0 %v598_v1  ;;  %s5435_s19 = smov (!%p226_p3, %s3073_s19), 1  ;;  %v1153_v25 = vsel %vm596_vm0, %v3130_v3, 0  ;;  %v3996_v60 = vld [vmem:[%s5310_s1 + $0x8] sm:$0x3]  ;;  %vm973_vm3 = vcmask 1045504   ;;  %vm2761_vm4 = vcmask 60416  }
   0xe   : > { %3782 = vmatprep.subr.msk.bf16.mxu1 %vm596_vm0, %v367_v2  ;;  %3783 = vmatprep.subr.msk.bf16.mxu0 %vm596_vm0, %v3130_v3  ;;  %s3790_s26 = smul.u32 216, %s5435_s19  ;;  %s3286_s21 = sshll.u32 %s5435_s19, 7  ;;  %vm2794_vm5 = vcmask 64512   ;;  %vm2864_vm6 = vcmask 57344  }
   0xf   : > { %s5097_s24 = scalar_lea.vmem %s5312_s3, %s3286_s21  ;;  %s238_s27 = scalar_lea.vmem %s5313_s4, %s5435_s19 }
  0x10   : > { %s3901_s29 = scalar_lea.vmem %s5309_s0, %s3790_s26  ;;  %s241_s30 = scalar_lea.vmem %s5314_s5, %s5435_s19 }
  0x11   : > { %v3904_v4 = vld [vmem:[%s3901_s29] sm:$0xff]   ;;  %v245_v5 = vld [vmem:[%s3901_s29 + $0x8] sm:$0x1]  ;;  %v3917_v12 = vld [vmem:[%s3901_s29 + $0xc] sm:$0xff]  }
  0x12   : > { %v3908_v6 = vld [vmem:[%s3901_s29 + $0x60] sm:$0xff]   ;;  %v297_v7 = vunpack.c.l.bf16 %v3904_v4  ;;  %v298_v8 = vunpack.c.h.bf16 %v3904_v4  ;;  %v299_v9 = vunpack.c.l.bf16 %v245_v5  ;;  %v3913_v10 = vld [vmem:[%s3901_s29 + $0x68] sm:$0x1]  ;;  %v3922_v15 = vld [vmem:[%s3901_s29 + $0x14] sm:$0x1]  ;;  %v300_v16 = vunpack.c.l.bf16 %v3917_v12 }
  0x13   : > { %v5329_v11 = vunpack.c.l.bf16 %v3908_v6  ;;  %v5328_v13 = vunpack.c.h.bf16 %v3908_v6  ;;  %v5327_v14 = vunpack.c.l.bf16 %v3913_v10  ;;  %v301_v21 = vunpack.c.h.bf16 %v3917_v12  ;;  %v3942_v30 = vld [vmem:[%s3901_s29 + $0x6c] sm:$0xff]   ;;  %v3948_v35 = vld [vmem:[%s3901_s29 + $0x74] sm:$0x1]  ;;  %v3956_v40 = vld [vmem:[%s3901_s29 + $0x18] sm:$0xff]  }
  0x14   : > { %v417_v18 = vrot.slane %v297_v7, 1  ;;  %v418_v19 = vrot.slane %v298_v8, 1  ;;  %v420_v20 = vrot.slane %v299_v9, 1  ;;  %v3929_v22 = vrot.slane %v297_v7, 2  ;;  %v3967_v45 = vld [vmem:[%s3901_s29 + $0x20] sm:$0x1] }
  0x15   : > { %v457_v23 = vrot.slane %v5329_v11, 1  ;;  %v458_v24 = vrot.slane %v5328_v13, 1  ;;  %v460_v28 = vrot.slane %v5327_v14, 1  ;;  %v5349_v29 = vunpack.c.l.bf16 %v3922_v15  ;;  %v3970_v46 = vld [vmem:[%s3901_s29 + $0x78] sm:$0xff]   ;;  %v3977_v51 = vld [vmem:[%s3901_s29 + $0x80] sm:$0x1] }
  0x16   : > { %v419_v26 = vsel %vm416_vm1, %v417_v18, %v418_v19  ;;  %v421_v27 = vsel %vm416_vm1, %v418_v19, %v420_v20  ;;  %v3944_v32 = vrot.slane %v298_v8, 2  ;;  %v422_v34 = vrot.slane %v300_v16, 1  ;;  %v4007_v1 = vld [vmem:[%s3901_s29 + $0x24] sm:$0xff]   ;;  %v4010_v2 = vld [vmem:[%s3901_s29 + $0x2c] sm:$0x1] }
  0x17   : > { %v529_v31 = vpack.c.bf16 %v421_v27, %v419_v26  ;;  %v459_v33 = vsel %vm416_vm1, %v457_v23, %v458_v24  ;;  %v3950_v36 = vrot.slane %v299_v9, 2  ;;  %v461_v37 = vsel %vm416_vm1, %v458_v24, %v460_v28  ;;  %v4019_v9 = vld [vmem:[%s3901_s29 + $0x84] sm:$0xff]   ;;  %v4035_v26 = vld [vmem:[%s3901_s29 + $0x8c] sm:$0x1]  ;;  %v4038_v27 = vld [vmem:[%s3901_s29 + $0x30] sm:$0xff]  }
  0x18   : > { %v423_v38 = vrot.slane %v301_v21, 1  ;;  %v425_v39 = vrot.slane %v5349_v29, 1  ;;  %v3959_v41 = vpack.c.bf16 %v461_v37, %v459_v33  ;;  %v3961_v42 = vrot.slane %v300_v16, 2  ;;  %v4043_v28 = vld [vmem:[%s5310_s1 + $0x6] sm:$0x3]  ;;  %v4151_v11 = vld [vmem:[%s3901_s29 + $0xa8] sm:$0xff]  }
  0x19   : > { %3474 = vmatprep.mubr.msk.bf16.mxu0 %vm547_vm2, %v529_v31  ;;  %v3963_v43 = vrot.slane %v301_v21, 2  ;;  %v5323_v44 = vunpack.c.l.bf16 %v3942_v30  ;;  %v5322_v49 = vunpack.c.h.bf16 %v3942_v30  ;;  %v5321_v50 = vunpack.c.l.bf16 %v3948_v35  ;;  %v4148_v13 = vld [vmem:[%s3901_s29 + $0x50] sm:$0x1] }
  0x1a   : > { %v424_v47 = vsel %vm416_vm1, %v422_v34, %v423_v38  ;;  %v426_v48 = vsel %vm416_vm1, %v423_v38, %v425_v39  ;;  %3490 = vmatprep.mubr.msk.bf16.mxu1 %vm547_vm2, %v3959_v41  ;;  %v5348_v54 = vunpack.c.l.bf16 %v3956_v40  ;;  %v5346_v55 = vunpack.c.h.bf16 %v3956_v40  ;;  %v4053_v38 = vld [vmem:[%s3901_s29 + $0x38] sm:$0x1] }
  0x1b   : > { %v3981_v52 = vpack.c.bf16 %v426_v48, %v424_v47  ;;  %v462_v53 = vrot.slane %v5323_v44, 1  ;;  %v463_v56 = vrot.slane %v5322_v49, 1  ;;  %v465_v57 = vrot.slane %v5321_v50, 1  ;;  %v4121_v44 = vld [vmem:[%s3901_s29 + $0xa4] sm:$0x1] }
  0x1c   : > { %v5342_v58 = vunpack.c.l.bf16 %v3967_v45  ;;  %v5317_v59 = vunpack.c.l.bf16 %v3970_v46  ;;  %v427_v61 = vrot.slane %v5348_v54, 1  ;;  %v428_v62 = vrot.slane %v5346_v55, 1  ;;  %v4213_v55 = vld [vmem:[%s3901_s29 + $0xbc] sm:$0x1] }
  0x1d   : > { %3475 = vmatmul.mubr.msk.bf16.vlgmr.msra.gmra.mxu0 %vm547_vm2, %v3981_v52  ;;  %v5316_v63 = vunpack.c.h.bf16 %v3970_v46  ;;  %v5315_v0 = vunpack.c.l.bf16 %v3977_v51  ;;  %v464_v3 = vsel %vm416_vm1, %v462_v53, %v463_v56  ;;  %v466_v5 = vsel %vm416_vm1, %v463_v56, %v465_v57 }
  0x1e   : > { %3541 = vmatpush3.bf16.msra.mxu0 %v1153_v25  ;;  %v430_v7 = vrot.slane %v5342_v58, 1  ;;  %v467_v8 = vrot.slane %v5317_v59, 1  ;;  %v4021_v16 = vpack.c.bf16 %v466_v5, %v464_v3  ;;  %v429_v18 = vsel %vm416_vm1, %v427_v61, %v428_v62  ;;  %v4108_v59 = vld [vmem:[%s3901_s29 + $0x44] sm:$0x1]  ;;  %v4186_v58 = vld [vmem:[%s3901_s29 + $0x5c] sm:$0x1] }
  0x1f   : > { %v468_v19 = vrot.slane %v5316_v63, 1  ;;  %v470_v20 = vrot.slane %v5315_v0, 1  ;;  %3785 = vmatprep.subr.msk.bf16.mxu0 %vm596_vm0, %v3996_v60  ;;  %v5341_v23 = vunpack.c.l.bf16 %v4007_v1  ;;  %v5340_v24 = vunpack.c.h.bf16 %v4007_v1 }
  0x20   : > { %v431_v21 = vsel %vm416_vm1, %v428_v62, %v430_v7  ;;  %v5339_v25 = vunpack.c.l.bf16 %v4010_v2  ;;  %3491 = vmatmul.mubr.msk.bf16.vlgmr.msra.gmra.mxu1 %vm547_vm2, %v4021_v16  ;;  %v5320_v37 = vunpack.c.l.bf16 %v4019_v9  ;;  %v5319_v56 = vunpack.c.h.bf16 %v4019_v9  ;;  %v4072_v62 = vld [vmem:[%s3901_s29 + $0x90] sm:$0xff]  }
  0x21   : > { %v4047_v31 = vpack.c.bf16 %v431_v21, %v429_v18  ;;  %v469_v33 = vsel %vm416_vm1, %v467_v8, %v468_v19  ;;  %v471_v34 = vsel %vm416_vm1, %v468_v19, %v470_v20  ;;  %3507 = vmatpush3.bf16.msra.mxu1 %v3926_v17  ;;  %v432_v47 = vrot.slane %v5341_v23, 1  ;;  %v4083_v18 = vld [vmem:[%s3901_s29 + $0x98] sm:$0x1]  ;;  %v4086_v19 = vld [vmem:[%s3901_s29 + $0x3c] sm:$0xff]  }
  0x22   : > { %v4056_v39 = vpack.c.bf16 %v471_v34, %v469_v33  ;;  %v433_v48 = vrot.slane %v5340_v24, 1  ;;  %v435_v53 = vrot.slane %v5339_v25, 1  ;;  %v5318_v17 = vunpack.c.l.bf16 %v4035_v26  ;;  %3784 = vmatprep.subr.msk.bf16.mxu1 %vm596_vm0, %v4043_v28 }
  0x23   : > { %3478 = vmatprep.mubr.msk.bf16.mxu0 %vm547_vm2, %v4047_v31  ;;  %v472_v57 = vrot.slane %v5320_v37, 1  ;;  %v5337_v61 = vunpack.c.l.bf16 %v4038_v27  ;;  %v5333_v7 = vunpack.c.h.bf16 %v4038_v27  ;;  %v5331_v8 = vunpack.c.l.bf16 %v4053_v38 }
  0x24   : > { %3494 = vmatprep.mubr.msk.bf16.mxu1 %vm547_vm2, %v4056_v39  ;;  %v434_v3 = vsel %vm416_vm1, %v432_v47, %v433_v48  ;;  %v436_v5 = vsel %vm416_vm1, %v433_v48, %v435_v53  ;;  %v473_v21 = vrot.slane %v5319_v56, 1  ;;  %v475_v33 = vrot.slane %v5318_v17, 1  ;;  %v4112_v56 = vld [vmem:[%s3901_s29 + $0x9c] sm:$0xff]  }
  0x25   : > { %v4088_v20 = vpack.c.bf16 %v436_v5, %v434_v3  ;;  %v437_v34 = vrot.slane %v5337_v61, 1  ;;  %v438_v47 = vrot.slane %v5333_v7, 1  ;;  %v440_v48 = vrot.slane %v5331_v8, 1  ;;  %v4176_v61 = vld [vmem:[%s3901_s29 + $0x54] sm:$0xff]  }
  0x26   : > { %v5326_v53 = vunpack.c.l.bf16 %v4072_v62  ;;  %v5325_v3 = vunpack.c.h.bf16 %v4072_v62  ;;  %v474_v5 = vsel %vm416_vm1, %v472_v57, %v473_v21  ;;  %v476_v0 = vsel %vm416_vm1, %v473_v21, %v475_v33 }
  0x27   : > { %3479 = vmatmul.mubr.msk.bf16.gmra.mxu0 %vm547_vm2, %v4088_v20  ;;  %v5324_v63 = vunpack.c.l.bf16 %v4083_v18  ;;  %v5330_v17 = vunpack.c.l.bf16 %v4086_v19  ;;  %v4114_v37 = vpack.c.bf16 %v476_v0, %v474_v5  ;;  %v439_v50 = vsel %vm416_vm1, %v437_v34, %v438_v47 }
  0x28   : > { %v441_v49 = vsel %vm416_vm1, %v438_v47, %v440_v48  ;;  %v477_v57 = vrot.slane %v5326_v53, 1  ;;  %v478_v33 = vrot.slane %v5325_v3, 1  ;;  %v5332_v5 = vunpack.c.h.bf16 %v4086_v19  ;;  %v4138_v48 = vld [vmem:[%s3901_s29 + $0x48] sm:$0xff]  }
  0x29   : > { %v4123_v21 = vpack.c.bf16 %v441_v49, %v439_v50  ;;  %v480_v0 = vrot.slane %v5324_v63, 1  ;;  %3495 = vmatmul.mubr.msk.bf16.gmra.mxu1 %vm547_vm2, %v4114_v37  ;;  %v5336_v34 = vunpack.c.l.bf16 %v4108_v59  ;;  %v442_v47 = vrot.slane %v5330_v17, 1 }
  0x2a   : > { %v5334_v49 = vunpack.c.l.bf16 %v4112_v56  ;;  %v5335_v50 = vunpack.c.h.bf16 %v4112_v56  ;;  %v479_v63 = vsel %vm416_vm1, %v477_v57, %v478_v33  ;;  %v443_v53 = vrot.slane %v5332_v5, 1 }
  0x2b   : > { %3482 = vmatprep.mubr.msk.bf16.mxu0 %vm547_vm2, %v4123_v21  ;;  %v481_v3 = vsel %vm416_vm1, %v478_v33, %v480_v0  ;;  %v5338_v14 = vunpack.c.l.bf16 %v4121_v44  ;;  %v445_v8 = vrot.slane %v5336_v34, 1  ;;  %v5345_v7 = vunpack.c.l.bf16 %v4138_v48 }
  0x2c   : > { %v4153_v17 = vpack.c.bf16 %v481_v3, %v479_v63  ;;  %v482_v57 = vrot.slane %v5334_v49, 1  ;;  %v483_v33 = vrot.slane %v5335_v50, 1  ;;  %v444_v0 = vsel %vm416_vm1, %v442_v47, %v443_v53  ;;  %v4167_v3 = vld [vmem:[%s3901_s29 + $0xb0] sm:$0x1] }
  0x2d   : > { %v485_v5 = vrot.slane %v5338_v14, 1  ;;  %v5344_v63 = vunpack.c.h.bf16 %v4138_v48  ;;  %v446_v49 = vsel %vm416_vm1, %v443_v53, %v445_v8  ;;  %v5343_v34 = vunpack.c.l.bf16 %v4148_v13 }
  0x2e   : > { %3498 = vmatprep.mubr.msk.bf16.mxu1 %vm547_vm2, %v4153_v17  ;;  %v484_v50 = vsel %vm416_vm1, %v482_v57, %v483_v33  ;;  %v5347_v47 = vunpack.c.l.bf16 %v4151_v11  ;;  %v4178_v14 = vpack.c.bf16 %v446_v49, %v444_v0  ;;  %v447_v24 = vrot.slane %v5345_v7, 1  ;;  %v4195_v0 = vld [vmem:[%s3901_s29 + $0xb4] sm:$0xff]  }
  0x2f   : > { %v486_v25 = vsel %vm416_vm1, %v483_v33, %v485_v5  ;;  %v448_v23 = vrot.slane %v5344_v63, 1  ;;  %v450_v53 = vrot.slane %v5343_v34, 1  ;;  %v5350_v57 = vunpack.c.h.bf16 %v4151_v11 }
  0x30   : > { %v4188_v8 = vpack.c.bf16 %v486_v25, %v484_v50  ;;  %v5351_v49 = vunpack.c.l.bf16 %v4167_v3  ;;  %3483 = vmatmul.mubr.msk.bf16.gmra.mxu0 %vm547_vm2, %v4178_v14  ;;  %v487_v33 = vrot.slane %v5347_v47, 1  ;;  %v5355_v25 = vunpack.c.l.bf16 %v4176_v61 }
  0x31   : > { %v449_v5 = vsel %vm416_vm1, %v447_v24, %v448_v23  ;;  %v5354_v50 = vunpack.c.h.bf16 %v4176_v61  ;;  %v451_v34 = vsel %vm416_vm1, %v448_v23, %v450_v53  ;;  %v488_v63 = vrot.slane %v5350_v57, 1 }
  0x32   : > { %5361 = vst [vmem:[#allocation2_spill] sm:$0xff] %v4188_v8  ;;  %3499 = vmatmul.mubr.msk.bf16.gmra.mxu1 %vm547_vm2, %v4188_v8  ;;  %v490_v7 = vrot.slane %v5351_v49, 1  ;;  %v5356_v24 = vunpack.c.l.bf16 %v4186_v58  ;;  %v4215_v47 = vpack.c.bf16 %v451_v34, %v449_v5  ;;  %v452_v54 = vrot.slane %v5355_v25, 1 }
  0x33   : > { %v453_v29 = vrot.slane %v5354_v50, 1  ;;  %v5358_v23 = vunpack.c.l.bf16 %v4195_v0  ;;  %v489_v53 = vsel %vm416_vm1, %v487_v33, %v488_v63  ;;  %v5357_v8 = vunpack.c.h.bf16 %v4195_v0 }
  0x34   : > { %v491_v57 = vsel %vm416_vm1, %v488_v63, %v490_v7  ;;  %v455_v49 = vrot.slane %v5356_v24, 1  ;;  %3486 = vmatprep.mubr.msk.bf16.mxu0 %vm547_vm2, %v4215_v47  ;;  %v5359_v50 = vunpack.c.l.bf16 %v4213_v55  ;;  %v5362_v33 = vunpack.c.l.bf16 %v3922_v15 }
  0x35   : > { %v4229_v34 = vpack.c.bf16 %v491_v57, %v489_v53  ;;  %v454_v5 = vsel %vm416_vm1, %v452_v54, %v453_v29  ;;  %v492_v25 = vrot.slane %v5358_v23, 1  ;;  %v493_v24 = vrot.slane %v5357_v8, 1 }
  0x36   : > { %v982_v7 = vrot.slane %v5362_v33, 2  ;;  %v456_v63 = vsel %vm416_vm1, %v453_v29, %v455_v49  ;;  %v976_v57 = vsel %vm973_vm3, %v3929_v22, %v3944_v32  ;;  %v495_v53 = vrot.slane %v5359_v50, 1 }
  0x37   : > { %3502 = vmatprep.mubr.msk.bf16.mxu1 %vm547_vm2, %v4229_v34  ;;  %v4245_v54 = vpack.c.bf16 %v456_v63, %v454_v5  ;;  %v978_v15 = vsel %vm973_vm3, %v3944_v32, %v3950_v36  ;;  %v494_v29 = vsel %vm416_vm1, %v492_v25, %v493_v24  ;;  %v5363_v33 = vunpack.c.l.bf16 %v3956_v40 }
  0x38   : > { %v1086_v49 = vpack.c.bf16 %v978_v15, %v976_v57  ;;  %v496_v22 = vsel %vm416_vm1, %v493_v24, %v495_v53  ;;  %v5364_v5 = vunpack.c.h.bf16 %v3956_v40  ;;  %v981_v32 = vsel %vm973_vm3, %v3961_v42, %v3963_v43 }
  0x39   : > { %3487 = vmatmul.mubr.msk.bf16.gmra.mxu0 %vm547_vm2, %v4245_v54  ;;  %v984_v8 = vrot.slane %v5363_v33, 2  ;;  %v4260_v23 = vpack.c.bf16 %v496_v22, %v494_v29  ;;  %v983_v36 = vsel %vm973_vm3, %v3963_v43, %v982_v7  ;;  %v5365_v25 = vunpack.c.l.bf16 %v3967_v45 }
  0x3a   : > { %v985_v63 = vrot.slane %v5364_v5, 2  ;;  %3542 = vmatprep.mubr.msk.bf16.mxu0 %vm547_vm2, %v1086_v49  ;;  %v5366_v15 = vunpack.c.l.bf16 %v4007_v1  ;;  %v5367_v49 = vunpack.c.h.bf16 %v4007_v1  ;;  %v5368_v42 = vunpack.c.l.bf16 %v4010_v2 }
  0x3b   : > { %v987_v24 = vrot.slane %v5365_v25, 2  ;;  %3503 = vmatmul.mubr.msk.bf16.gmra.mxu1 %vm547_vm2, %v4260_v23  ;;  %v4282_v43 = vpack.c.bf16 %v983_v36, %v981_v32  ;;  %v5369_v45 = vunpack.c.l.bf16 %v4038_v27  ;;  %v5370_v7 = vunpack.c.h.bf16 %v4038_v27  ;;  %v4299_v32 = vld [vmem:[%s5310_s1 + $0xc] sm:$0x3] }
  0x3c   : > { %v986_v57 = vsel %vm973_vm3, %v984_v8, %v985_v63  ;;  %v989_v29 = vrot.slane %v5366_v15, 2  ;;  %v990_v22 = vrot.slane %v5367_v49, 2  ;;  %v992_v33 = vrot.slane %v5368_v42, 2  ;;  %3508 = vmatprep.mubr.msk.bf16.mxu1 %vm547_vm2, %v3904_v4  ;;  %v4318_v42 = vld [vmem:[%s5310_s1 + $0xa] sm:$0x3] }
  0x3d   : > { %v988_v53 = vsel %vm973_vm3, %v985_v63, %v987_v24  ;;  %v994_v8 = vrot.slane %v5369_v45, 2  ;;  %v995_v5 = vrot.slane %v5370_v7, 2  ;;  %v5371_v63 = vunpack.c.l.bf16 %v4053_v38 }
  0x3e   : > { %v4290_v24 = vpack.c.bf16 %v988_v53, %v986_v57  ;;  %v1567_v2 = vsel %vm596_vm0, %v3996_v60, 0  ;;  %v991_v15 = vsel %vm973_vm3, %v989_v29, %v990_v22  ;;  %v993_v4 = vsel %vm973_vm3, %v990_v22, %v992_v33 }
  0x3f   : > { %v997_v25 = vrot.slane %v5371_v63, 2  ;;  %v996_v38 = vsel %vm973_vm3, %v994_v8, %v995_v5  ;;  %v1355_v57 = vsel %vm596_vm0, %v4043_v28, 0  ;;  %v4309_v60 = vpack.c.bf16 %v993_v4, %v991_v15 }
  0x40   : > { %v5372_v53 = vunpack.c.l.bf16 %v4086_v19  ;;  %v5373_v49 = vunpack.c.l.bf16 %v3908_v6  ;;  %v5374_v33 = vunpack.c.h.bf16 %v4086_v19  ;;  %v5375_v8 = vunpack.c.h.bf16 %v3908_v6 }
  0x41   : > { %3543 = vmatmul.mubr.msk.bf16.vlgmr.msra.gmra.mxu0 %vm547_vm2, %v4282_v43  ;;  %v998_v36 = vsel %vm973_vm3, %v995_v5, %v997_v25  ;;  %v5376_v5 = vunpack.c.l.bf16 %v3913_v10  ;;  %v5377_v25 = vunpack.c.l.bf16 %v4108_v59  ;;  %v5378_v15 = vunpack.c.l.bf16 %v3942_v30 }
  0x42   : > { %3609 = vmatpush3.bf16.msra.mxu0 %v1567_v2  ;;  %3546 = vmatprep.mubr.msk.bf16.mxu0 %vm547_vm2, %v4290_v24  ;;  %v999_v29 = vrot.slane %v5372_v53, 2  ;;  %v1014_v22 = vrot.slane %v5373_v49, 2  ;;  %v4324_v28 = vpack.c.bf16 %v998_v36, %v996_v38  ;;  %v1000_v45 = vrot.slane %v5374_v33, 2 }
  0x43   : > { %3787 = vmatprep.subr.msk.bf16.mxu0 %vm596_vm0, %v4299_v32  ;;  %3509 = vmatmul.mubr.msk.bf16.vlgmr.msra.gmra.mxu1 %vm547_vm2, %v3917_v12  ;;  %v1015_v7 = vrot.slane %v5375_v8, 2  ;;  %v1017_v63 = vrot.slane %v5376_v5, 2  ;;  %v1002_v2 = vrot.slane %v5377_v25, 2  ;;  %v1019_v4 = vrot.slane %v5378_v15, 2 }
  0x44   : > { %3575 = vmatpush3.bf16.msra.mxu1 %v1355_v57  ;;  %3512 = vmatprep.mubr.msk.bf16.mxu1 %vm547_vm2, %v3956_v40  ;;  %v5379_v38 = vunpack.c.h.bf16 %v3942_v30  ;;  %v5380_v53 = vunpack.c.l.bf16 %v3948_v35  ;;  %v5381_v33 = vunpack.c.l.bf16 %v4138_v48  ;;  %v5382_v57 = vunpack.c.h.bf16 %v4138_v48 }
  0x45   : > { %v1016_v5 = vsel %vm973_vm3, %v1014_v22, %v1015_v7  ;;  %v1018_v59 = vsel %vm973_vm3, %v1015_v7, %v1017_v63  ;;  %3786 = vmatprep.subr.msk.bf16.mxu1 %vm596_vm0, %v4318_v42  ;;  %v5383_v25 = vunpack.c.l.bf16 %v4148_v13  ;;  %v5385_v22 = vunpack.c.h.bf16 %v4019_v9 }
  0x46   : > { %v1020_v36 = vrot.slane %v5379_v38, 2  ;;  %v1022_v49 = vrot.slane %v5380_v53, 2  ;;  %v1004_v10 = vrot.slane %v5381_v33, 2  ;;  %v1005_v8 = vrot.slane %v5382_v57, 2 }
  0x47   : > { %v1007_v15 = vrot.slane %v5383_v25, 2  ;;  %v4352_v38 = vpack.c.bf16 %v1018_v59, %v1016_v5  ;;  %v5384_v57 = vunpack.c.l.bf16 %v4019_v9  ;;  %v1030_v7 = vrot.slane %v5385_v22, 2 }
  0x48   : > { %v1021_v35 = vsel %vm973_vm3, %v1019_v4, %v1020_v36  ;;  %v1023_v53 = vsel %vm973_vm3, %v1020_v36, %v1022_v49  ;;  %v5386_v13 = vunpack.c.l.bf16 %v4035_v26  ;;  %v1001_v4 = vsel %vm973_vm3, %v999_v29, %v1000_v45 }
  0x49   : > { %v4356_v33 = vpack.c.bf16 %v1023_v53, %v1021_v35  ;;  %v1029_v50 = vrot.slane %v5384_v57, 2  ;;  %3547 = vmatmul.mubr.msk.bf16.gmra.mxu0 %vm547_vm2, %v4309_v60  ;;  %v1003_v36 = vsel %vm973_vm3, %v1000_v45, %v1002_v2  ;;  %v1006_v49 = vsel %vm973_vm3, %v1004_v10, %v1005_v8 }
  0x4a   : > { %v1032_v63 = vrot.slane %v5386_v13, 2  ;;  %3550 = vmatprep.mubr.msk.bf16.mxu0 %vm547_vm2, %v4324_v28  ;;  %v1008_v5 = vsel %vm973_vm3, %v1005_v8, %v1007_v15  ;;  %v5387_v35 = vunpack.c.l.bf16 %v4112_v56  ;;  %v4382_v29 = vpack.c.bf16 %v1003_v36, %v1001_v4 }
  0x4b   : > { %v1031_v59 = vsel %vm973_vm3, %v1029_v50, %v1030_v7  ;;  %3513 = vmatmul.mubr.msk.bf16.gmra.mxu1 %vm547_vm2, %v4007_v1  ;;  %v5388_v45 = vunpack.c.h.bf16 %v4112_v56  ;;  %v5389_v50 = vunpack.c.l.bf16 %v4121_v44  ;;  %v4388_v8 = vpack.c.bf16 %v1008_v5, %v1006_v49 }
  0x4c   : > { %v1033_v25 = vsel %vm973_vm3, %v1030_v7, %v1032_v63  ;;  %v1039_v53 = vrot.slane %v5387_v35, 2  ;;  %3516 = vmatprep.mubr.msk.bf16.mxu1 %vm547_vm2, %v4038_v27  ;;  %v5390_v15 = vunpack.c.l.bf16 %v4176_v61  ;;  %v5391_v22 = vunpack.c.h.bf16 %v4176_v61 }
  0x4d   : > { %v4376_v26 = vpack.c.bf16 %v1033_v25, %v1031_v59  ;;  %v1040_v2 = vrot.slane %v5388_v45, 2  ;;  %v1042_v10 = vrot.slane %v5389_v50, 2  ;;  %v5392_v13 = vunpack.c.l.bf16 %v4186_v58 }
  0x4e   : > { %v1009_v57 = vrot.slane %v5390_v15, 2  ;;  %v1010_v7 = vrot.slane %v5391_v22, 2  ;;  %v5393_v5 = vunpack.c.l.bf16 %v3970_v46  ;;  %v5394_v35 = vunpack.c.h.bf16 %v3970_v46 }
  0x4f   : > { %v1012_v63 = vrot.slane %v5392_v13, 2  ;;  %v1041_v4 = vsel %vm973_vm3, %v1039_v53, %v1040_v2  ;;  %v1043_v36 = vsel %vm973_vm3, %v1040_v2, %v1042_v10  ;;  %v5395_v45 = vunpack.c.l.bf16 %v3977_v51 }
  0x50   : > { %v4398_v59 = vpack.c.bf16 %v1043_v36, %v1041_v4  ;;  %v1011_v44 = vsel %vm973_vm3, %v1009_v57, %v1010_v7  ;;  %v1024_v25 = vrot.slane %v5393_v5, 2  ;;  %v1025_v53 = vrot.slane %v5394_v35, 2 }
  0x51   : > { %3551 = vmatmul.mubr.msk.bf16.gmra.mxu0 %vm547_vm2, %v4382_v29  ;;  %v1013_v49 = vsel %vm973_vm3, %v1010_v7, %v1012_v63  ;;  %v1027_v2 = vrot.slane %v5395_v45, 2  ;;  %v5396_v51 = vunpack.c.l.bf16 %v4072_v62  ;;  %v5397_v22 = vunpack.c.h.bf16 %v4072_v62 }
  0x52   : > { %3554 = vmatprep.mubr.msk.bf16.mxu0 %vm547_vm2, %v4388_v8  ;;  %v4410_v58 = vpack.c.bf16 %v1013_v49, %v1011_v44  ;;  %v1026_v50 = vsel %vm973_vm3, %v1024_v25, %v1025_v53  ;;  %v5398_v13 = vunpack.c.l.bf16 %v4083_v18  ;;  %v5399_v18 = vunpack.c.l.bf16 %v4151_v11 }
  0x53   : > { %3517 = vmatmul.mubr.msk.bf16.gmra.mxu1 %vm547_vm2, %v4086_v19  ;;  %v1028_v10 = vsel %vm973_vm3, %v1025_v53, %v1027_v2  ;;  %v1034_v57 = vrot.slane %v5396_v51, 2  ;;  %v1035_v7 = vrot.slane %v5397_v22, 2  ;;  %v5400_v5 = vunpack.c.h.bf16 %v4151_v11 }
  0x54   : > { %3520 = vmatprep.mubr.msk.bf16.mxu1 %vm547_vm2, %v4138_v48  ;;  %v4428_v15 = vpack.c.bf16 %v1028_v10, %v1026_v50  ;;  %v1037_v63 = vrot.slane %v5398_v13, 2  ;;  %v1044_v49 = vrot.slane %v5399_v18, 2  ;;  %v5401_v35 = vunpack.c.l.bf16 %v4167_v3  ;;  %v4473_v13 = vld [vmem:[%s3901_s29 + $0xc0] sm:$0xff]  }
  0x55   : > { %v1036_v4 = vsel %vm973_vm3, %v1034_v57, %v1035_v7  ;;  %v1045_v25 = vrot.slane %v5400_v5, 2  ;;  %v5402_v3 = vunpack.c.l.bf16 %v4195_v0  ;;  %v5403_v51 = vunpack.c.h.bf16 %v4195_v0 }
  0x56   : > { %v1038_v36 = vsel %vm973_vm3, %v1035_v7, %v1037_v63  ;;  %v1047_v53 = vrot.slane %v5401_v35, 2  ;;  %v5404_v22 = vunpack.c.l.bf16 %v4213_v55  ;;  %v345_v18 = vunpack.c.l.bf16 %v4473_v13 }
  0x57   : > { %v4446_v44 = vpack.c.bf16 %v1038_v36, %v1036_v4  ;;  %v1046_v45 = vsel %vm973_vm3, %v1044_v49, %v1045_v25  ;;  %v1049_v10 = vrot.slane %v5402_v3, 2  ;;  %v1050_v57 = vrot.slane %v5403_v51, 2  ;;  %v293_v36 = vld [vmem:[%s3901_s29 + $0xc8] sm:$0x1]  ;;  %v3234_v51 = vld [vmem:[%s5310_s1 + $0x10] sm:$0x3] }
  0x58   : > { %v1048_v2 = vsel %vm973_vm3, %v1045_v25, %v1047_v53  ;;  %v1052_v7 = vrot.slane %v5404_v22, 2  ;;  %v346_v49 = vunpack.c.h.bf16 %v4473_v13  ;;  %v1762_v5 = vrot.slane %v345_v18, 2 }
  0x59   : > { %3555 = vmatmul.mubr.msk.bf16.gmra.mxu0 %vm547_vm2, %v4410_v58  ;;  %v4464_v50 = vpack.c.bf16 %v1048_v2, %v1046_v45  ;;  %v1051_v63 = vsel %vm973_vm3, %v1049_v10, %v1050_v57  ;;  %v347_v35 = vunpack.c.l.bf16 %v293_v36  ;;  %v1978_v10 = vsel %vm596_vm0, %v4299_v32, 0  ;;  %v5405_v32 = vld [vmem:[#allocation2_spill] sm:$0xff] }
  0x5a   : > { %3558 = vmatprep.mubr.msk.bf16.mxu0 %vm547_vm2, %v4352_v38  ;;  %v1053_v4 = vsel %vm973_vm3, %v1050_v57, %v1052_v7  ;;  %v1763_v25 = vrot.slane %v346_v49, 2  ;;  %v1554_v57 = vrot.slane %v346_v49, 1  ;;  %v2399_v36 = vsel %vm596_vm0, %v3234_v51, 0 }
  0x5b   : > { %3521 = vmatmul.mubr.msk.bf16.gmra.mxu1 %vm547_vm2, %v4176_v61  ;;  %v4488_v55 = vpack.c.bf16 %v1053_v4, %v1051_v63  ;;  %v1765_v53 = vrot.slane %v347_v35, 2  ;;  %v1556_v22 = vrot.slane %v347_v35, 1 }
  0x5c   : > { %3524 = vmatprep.mubr.msk.bf16.mxu1 %vm547_vm2, %v3908_v6  ;;  %v1764_v45 = vsel %vm973_vm3, %v1762_v5, %v1763_v25 }
  0x5d   : > { %v1766_v2 = vsel %vm973_vm3, %v1763_v25, %v1765_v53  ;;  %v1557_v63 = vsel %vm416_vm1, %v1554_v57, %v1556_v22  ;;  %v4667_v53 = vld [vmem:[%s3901_s29 + $0xcc] sm:$0xff]  }
  0x5e   : > { %v4496_v3 = vpack.c.bf16 %v1766_v2, %v1764_v45 }
  0x61   : > { %3559 = vmatmul.mubr.msk.bf16.gmra.mxu0 %vm547_vm2, %v4356_v33 }
  0x62   : > { %3562 = vmatprep.mubr.msk.bf16.mxu0 %vm547_vm2, %v4428_v15 }
  0x63   : > { %3525 = vmatmul.mubr.msk.bf16.gmra.mxu1 %vm547_vm2, %v3942_v30 }
  0x64   : > { %3528 = vmatprep.mubr.msk.bf16.mxu1 %vm547_vm2, %v3970_v46 }
  0x69   : > { %3563 = vmatmul.mubr.msk.bf16.gmra.mxu0 %vm547_vm2, %v4376_v26 }
  0x6a   : > { %3566 = vmatprep.mubr.msk.bf16.mxu0 %vm547_vm2, %v4446_v44 }
  0x6b   : > { %3529 = vmatmul.mubr.msk.bf16.gmra.mxu1 %vm547_vm2, %v4019_v9 }
  0x6c   : > { %3532 = vmatprep.mubr.msk.bf16.mxu1 %vm547_vm2, %v4072_v62 }
  0x71   : > { %3567 = vmatmul.mubr.msk.bf16.gmra.mxu0 %vm547_vm2, %v4398_v59 }
  0x72   : > { %3570 = vmatprep.mubr.msk.bf16.mxu0 %vm547_vm2, %v4464_v50 }
  0x73   : > { %3533 = vmatmul.mubr.msk.bf16.gmra.mxu1 %vm547_vm2, %v4112_v56 }
  0x74   : > { %3536 = vmatprep.mubr.msk.bf16.mxu1 %vm547_vm2, %v4151_v11 }
  0x79   : > { %3571 = vmatmul.mubr.msk.bf16.gmra.mxu0 %vm547_vm2, %v4488_v55 }
  0x7a   : > { %3610 = vmatprep.mubr.msk.bf16.mxu0 %vm547_vm2, %v3981_v52  ;;  %v1776_v52 = vsel %vm596_vm0, %v4318_v42, 0  ;;  %v1553_v42 = vrot.slane %v345_v18, 1 }
  0x7b   : > { %3537 = vmatmul.mubr.msk.bf16.gmra.mxu1 %vm547_vm2, %v4195_v0 }
  0x7c   : > { %3576 = vmatprep.mubr.msk.bf16.mxu1 %vm547_vm2, %v3917_v12  ;;  %v3217_v12 = vld [vmem:[%s5310_s1 + $0xe] sm:$0x3]  ;;  %v1555_v7 = vsel %vm416_vm1, %v1553_v42, %v1554_v57 }
  0x7d   : > { %v4572_v4 = vpack.c.bf16 %v1557_v63, %v1555_v7  ;;  %v2190_v18 = vsel %vm596_vm0, %v3217_v12, 0 }
  0x7f   : > { %5406 = vst [vmem:[#allocation2_spill] sm:$0xff] %v4572_v4 }
  0x81   : > { %3611 = vmatmul.mubr.msk.bf16.vlgmr.msra.gmra.mxu0 %vm547_vm2, %v4047_v31 }
  0x82   : > { %3677 = vmatpush3.bf16.msra.mxu0 %v1978_v10  ;;  %3614 = vmatprep.mubr.msk.bf16.mxu0 %vm547_vm2, %v4088_v20 }
  0x83   : > { %3789 = vmatprep.subr.msk.bf16.mxu0 %vm596_vm0, %v3234_v51  ;;  %3577 = vmatmul.mubr.msk.bf16.vlgmr.msra.gmra.mxu1 %vm547_vm2, %v3956_v40 }
  0x84   : > { %3643 = vmatpush3.bf16.msra.mxu1 %v1776_v52  ;;  %3580 = vmatprep.mubr.msk.bf16.mxu1 %vm547_vm2, %v4007_v1 }
  0x85   : > { %3788 = vmatprep.subr.msk.bf16.mxu1 %vm596_vm0, %v3217_v12 }
  0x89   : > { %3615 = vmatmul.mubr.msk.bf16.gmra.mxu0 %vm547_vm2, %v4123_v21 }
  0x8a   : > { %3618 = vmatprep.mubr.msk.bf16.mxu0 %vm547_vm2, %v4178_v14 }
  0x8b   : > { %3581 = vmatmul.mubr.msk.bf16.gmra.mxu1 %vm547_vm2, %v4038_v27 }
  0x8c   : > { %3584 = vmatprep.mubr.msk.bf16.mxu1 %vm547_vm2, %v4086_v19 }
  0x91   : > { %3619 = vmatmul.mubr.msk.bf16.gmra.mxu0 %vm547_vm2, %v4215_v47 }
  0x92   : > { %3622 = vmatprep.mubr.msk.bf16.mxu0 %vm547_vm2, %v4245_v54 }
  0x93   : > { %3585 = vmatmul.mubr.msk.bf16.gmra.mxu1 %vm547_vm2, %v4138_v48 }
  0x94   : > { %3588 = vmatprep.mubr.msk.bf16.mxu1 %vm547_vm2, %v4176_v61 }
  0x99   : > { %3623 = vmatmul.mubr.msk.bf16.gmra.mxu0 %vm547_vm2, %v3959_v41 }
  0x9a   : > { %3626 = vmatprep.mubr.msk.bf16.mxu0 %vm547_vm2, %v4021_v16 }
  0x9b   : > { %3589 = vmatmul.mubr.msk.bf16.gmra.mxu1 %vm547_vm2, %v3908_v6 }
  0x9c   : > { %3592 = vmatprep.mubr.msk.bf16.mxu1 %vm547_vm2, %v3942_v30 }
  0xa1   : > { %3627 = vmatmul.mubr.msk.bf16.gmra.mxu0 %vm547_vm2, %v4056_v39 }
  0xa2   : > { %3630 = vmatprep.mubr.msk.bf16.mxu0 %vm547_vm2, %v4114_v37 }
  0xa3   : > { %3593 = vmatmul.mubr.msk.bf16.gmra.mxu1 %vm547_vm2, %v3970_v46 }
  0xa4   : > { %3596 = vmatprep.mubr.msk.bf16.mxu1 %vm547_vm2, %v4019_v9 }
  0xa9   : > { %3631 = vmatmul.mubr.msk.bf16.gmra.mxu0 %vm547_vm2, %v4153_v17 }
  0xaa   : > { %3634 = vmatprep.mubr.msk.bf16.mxu0 %vm547_vm2, %v5405_v32 }
  0xab   : > { %3597 = vmatmul.mubr.msk.bf16.gmra.mxu1 %vm547_vm2, %v4072_v62 }
  0xac   : > { %3600 = vmatprep.mubr.msk.bf16.mxu1 %vm547_vm2, %v4112_v56 }
  0xb1   : > { %3635 = vmatmul.mubr.msk.bf16.gmra.mxu0 %vm547_vm2, %v4229_v34 }
  0xb2   : > { %3638 = vmatprep.mubr.msk.bf16.mxu0 %vm547_vm2, %v4260_v23 }
  0xb3   : > { %3601 = vmatmul.mubr.msk.bf16.gmra.mxu1 %vm547_vm2, %v4151_v11 }
  0xb4   : > { %3604 = vmatprep.mubr.msk.bf16.mxu1 %vm547_vm2, %v4195_v0 }
  0xb9   : > { %3639 = vmatmul.mubr.msk.bf16.gmra.mxu0 %vm547_vm2, %v4572_v4 }
  0xba   : > { %3678 = vmatprep.mubr.msk.bf16.mxu0 %vm547_vm2, %v3956_v40 }
  0xbb   : > { %3605 = vmatmul.mubr.msk.bf16.gmra.mxu1 %vm547_vm2, %v4473_v13 }
  0xbc   : > { %3644 = vmatprep.mubr.msk.bf16.mxu1 %vm547_vm2, %v4282_v43 }
  0xc1   : > { %3679 = vmatmul.mubr.msk.bf16.vlgmr.msra.gmra.mxu0 %vm547_vm2, %v4007_v1 }
  0xc2   : > { %3745 = vmatpush3.bf16.msra.mxu0 %v2399_v36  ;;  %3682 = vmatprep.mubr.msk.bf16.mxu0 %vm547_vm2, %v4038_v27 }
  0xc3   : > { %3645 = vmatmul.mubr.msk.bf16.vlgmr.msra.gmra.mxu1 %vm547_vm2, %v4290_v24 }
  0xc4   : > { %3711 = vmatpush3.bf16.msra.mxu1 %v2190_v18  ;;  %3648 = vmatprep.mubr.msk.bf16.mxu1 %vm547_vm2, %v4309_v60 }
  0xc9   : > { %3683 = vmatmul.mubr.msk.bf16.gmra.mxu0 %vm547_vm2, %v4086_v19 }
  0xca   : > { %3686 = vmatprep.mubr.msk.bf16.mxu0 %vm547_vm2, %v4138_v48 }
  0xcb   : > { %3649 = vmatmul.mubr.msk.bf16.gmra.mxu1 %vm547_vm2, %v4324_v28 }
  0xcc   : > { %3652 = vmatprep.mubr.msk.bf16.mxu1 %vm547_vm2, %v4382_v29 }
  0xd1   : > { %3687 = vmatmul.mubr.msk.bf16.gmra.mxu0 %vm547_vm2, %v4176_v61 }
  0xd2   : > { %3690 = vmatprep.mubr.msk.bf16.mxu0 %vm547_vm2, %v3908_v6 }
  0xd3   : > { %3653 = vmatmul.mubr.msk.bf16.gmra.mxu1 %vm547_vm2, %v4388_v8 }
  0xd4   : > { %3656 = vmatprep.mubr.msk.bf16.mxu1 %vm547_vm2, %v4410_v58 }
  0xd9   : > { %3691 = vmatmul.mubr.msk.bf16.gmra.mxu0 %vm547_vm2, %v3942_v30 }
  0xda   : > { %3694 = vmatprep.mubr.msk.bf16.mxu0 %vm547_vm2, %v3970_v46 }
  0xdb   : > { %3657 = vmatmul.mubr.msk.bf16.gmra.mxu1 %vm547_vm2, %v4352_v38 }
  0xdc   : > { %3660 = vmatprep.mubr.msk.bf16.mxu1 %vm547_vm2, %v4356_v33 }
  0xdd   : > { %v3476_v40 = vpop.f32.mrf.mxu0 }
  0xdf   : > { %v634_v6 = vpop.f32.mrf.mxu0 }
  0xe0   : > { %v4616_v1 = vpop.f32.mrf.mxu1 }
  0xe1   : > { %3695 = vmatmul.mubr.msk.bf16.gmra.mxu0 %vm547_vm2, %v4019_v9  ;;  %v3477_v27 = vpop.f32.mrf.mxu0 }
  0xe2   : > { %3698 = vmatprep.mubr.msk.bf16.mxu0 %vm547_vm2, %v4072_v62  ;;  %v4622_v30 = vpop.f32.mrf.mxu1 }
  0xe3   : > { %v4624_v46 = vpop.f32.mrf.mxu0  ;;  %3661 = vmatmul.mubr.msk.bf16.gmra.mxu1 %vm547_vm2, %v4428_v15 }
  0xe4   : > { %v4628_v61 = vpop.f32.mrf.mxu1  ;;  %3664 = vmatprep.mubr.msk.bf16.mxu1 %vm547_vm2, %v4376_v26 }
  0xe6   : > { %v4632_v19 = vpop.f32.mrf.mxu1 }
  0xe7   : > { %v4634_v48 = vpop.f32.mrf.mxu0 }
  0xe9   : > { %3699 = vmatmul.mubr.msk.bf16.gmra.mxu0 %vm547_vm2, %v4112_v56  ;;  %v4638_v9 = vpop.f32.mrf.mxu0  ;;  %v4640_v62 = vpop.f32.mrf.mxu1 }
  0xea   : > { %3702 = vmatprep.mubr.msk.bf16.mxu0 %vm547_vm2, %v4151_v11 }
  0xeb   : > { %v4644_v43 = vpop.f32.mrf.mxu0  ;;  %3665 = vmatmul.mubr.msk.bf16.gmra.mxu1 %vm547_vm2, %v4446_v44  ;;  %v4648_v49 = vpop.f32.mrf.mxu1 }
  0xec   : > { %3668 = vmatprep.mubr.msk.bf16.mxu1 %vm547_vm2, %v4398_v59 }
  0xed   : > { %v4650_v5 = vpop.f32.mrf.mxu0  ;;  %v4654_v56 = vpop.f32.mrf.mxu1 }
  0xef   : > { %v4656_v25 = vpop.f32.mrf.mxu1 }
  0xf0   : > { %v4658_v35 = vpop.f32.mrf.mxu0 }
  0xf1   : > { %3703 = vmatmul.mubr.msk.bf16.gmra.mxu0 %vm547_vm2, %v4195_v0 }
  0xf2   : > { %v4662_v11 = vpop.f32.mrf.mxu1  ;;  %3706 = vmatprep.mubr.msk.bf16.mxu0 %vm547_vm2, %v4473_v13  ;;  %v4669_v45 = vpop.f32.mrf.mxu0 }
  0xf3   : > { %5407 = vst [vmem:[#allocation3_spill] sm:$0xff] %v4662_v11  ;;  %3669 = vmatmul.mubr.msk.bf16.gmra.mxu1 %vm547_vm2, %v4464_v50 }
  0xf4   : > { %v4673_v2 = vpop.f32.mrf.mxu1  ;;  %v4675_v10 = vpop.f32.mrf.mxu0  ;;  %3672 = vmatprep.mubr.msk.bf16.mxu1 %vm547_vm2, %v4488_v55 }
  0xf5   : > { %5408 = vst [vmem:[#allocation4_spill] sm:$0xff] %v4673_v2 }
  0xf6   : > { %v4679_v0 = vpop.f32.mrf.mxu1  ;;  %v4681_v51 = vpop.f32.mrf.mxu0 }
  0xf7   : > { %5409 = vst [vmem:[#allocation5_spill] sm:$0xff] %v4679_v0 }
  0xf8   : > { %v4683_v52 = vpop.f32.mrf.mxu1 }
  0xf9   : > { %5410 = vst [vmem:[#allocation6_spill] sm:$0xff] %v4683_v52  ;;  %v4685_v13 = vpop.f32.mrf.mxu0  ;;  %3707 = vmatmul.mubr.msk.bf16.gmra.mxu0 %vm547_vm2, %v4667_v53 }
  0xfa   : > { %3746 = vmatprep.mubr.msk.bf16.mxu0 %vm547_vm2, %v4290_v24 }
  0xfb   : > { %v4691_v12 = vpop.f32.mrf.mxu0  ;;  %v4693_v42 = vpop.f32.mrf.mxu1  ;;  %3673 = vmatmul.mubr.msk.bf16.gmra.mxu1 %vm547_vm2, %v4496_v3 }
  0xfc   : > { %5411 = vst [vmem:[#allocation7_spill] sm:$0xff] %v4693_v42  ;;  %3712 = vmatprep.mubr.msk.bf16.mxu1 %vm547_vm2, %v4047_v31 }
  0xfd   : > { %v4697_v57 = vpop.f32.mrf.mxu0  ;;  %v4701_v22 = vpop.f32.mrf.mxu1 }
  0xfe   : > { %5412 = vst [vmem:[#allocation8_spill] sm:$0xff] %v4701_v22 }
  0xff   : > { %v4703_v7 = vpop.f32.mrf.mxu0  ;;  %v4705_v63 = vpop.f32.mrf.mxu1 }
 0x100   : > { %5413 = vst [vmem:[#allocation9_spill] sm:$0xff] %v4705_v63 }
 0x101   : > { %v3544_v36 = vpop.f32.mrf.mxu0  ;;  %3747 = vmatmul.mubr.msk.bf16.vlgmr.msra.gmra.mxu0 %vm547_vm2, %v4309_v60  ;;  %v4709_v24 = vpop.f32.mrf.mxu1 }
 0x102   : > { %5414 = vst [vmem:[#allocation10_spill] sm:$0xff] %v4709_v24  ;;  %3750 = vmatprep.mubr.msk.bf16.mxu0 %vm547_vm2, %v4324_v28 }
 0x103   : > { %v1189_v18 = vpop.f32.mrf.mxu0  ;;  %v3510_v42 = vpop.f32.mrf.mxu1  ;;  %3713 = vmatmul.mubr.msk.bf16.vlgmr.msra.gmra.mxu1 %vm547_vm2, %v4088_v20 }
 0x104   : > { %v855_v31 = vadd.f32 %v3510_v42, %v3476_v40  ;;  %3716 = vmatprep.mubr.msk.bf16.mxu1 %vm547_vm2, %v4123_v21 }
 0x105   : > { %v3545_v22 = vpop.f32.mrf.mxu0  ;;  %v846_v63 = vpop.f32.mrf.mxu1 }
 0x106   : > { %v4717_v52 = vadd.f32 %v3544_v36, %v855_v31  ;;  %v847_v0 = vadd.f32 %v846_v63, %v634_v6 }
 0x107   : > { %v1192_v60 = vpop.f32.mrf.mxu0  ;;  %v3511_v2 = vpop.f32.mrf.mxu1 }
 0x108   : > { %v4719_v24 = vadd.f32 %v1189_v18, %v847_v0  ;;  %v858_v4 = vadd.f32 %v3511_v2, %v3477_v27 }
 0x109   : > { %v3548_v28 = vpop.f32.mrf.mxu0  ;;  %3751 = vmatmul.mubr.msk.bf16.gmra.mxu0 %vm547_vm2, %v4382_v29  ;;  %v849_v11 = vpop.f32.mrf.mxu1 }
 0x10a   : > { %3754 = vmatprep.mubr.msk.bf16.mxu0 %vm547_vm2, %v4388_v8  ;;  %v4725_v20 = vadd.f32 %v3545_v22, %v858_v4  ;;  %v850_v21 = vadd.f32 %v849_v11, %v4624_v46 }
 0x10b   : > { %v1205_v40 = vpop.f32.mrf.mxu0  ;;  %v3514_v42 = vpop.f32.mrf.mxu1  ;;  %3717 = vmatmul.mubr.msk.bf16.gmra.mxu1 %vm547_vm2, %v4178_v14 }
 0x10c   : > { %v4730_v6 = vadd.f32 %v1192_v60, %v850_v21  ;;  %v871_v27 = vadd.f32 %v3514_v42, %v4634_v48  ;;  %3720 = vmatprep.mubr.msk.bf16.mxu1 %vm547_vm2, %v4215_v47 }
 0x10d   : > { %v3549_v2 = vpop.f32.mrf.mxu0  ;;  %v862_v29 = vpop.f32.mrf.mxu1 }
 0x10e   : > { %v4735_v0 = vadd.f32 %v3548_v28, %v871_v27  ;;  %v863_v8 = vadd.f32 %v862_v29, %v4638_v9 }
 0x10f   : > { %v1208_v4 = vpop.f32.mrf.mxu0  ;;  %v3515_v46 = vpop.f32.mrf.mxu1 }
 0x110   : > { %v4738_v11 = vadd.f32 %v1205_v40, %v863_v8  ;;  %v874_v22 = vadd.f32 %v3515_v46, %v4644_v43 }
 0x111   : > { %v3552_v14 = vpop.f32.mrf.mxu0  ;;  %3755 = vmatmul.mubr.msk.bf16.gmra.mxu0 %vm547_vm2, %v4410_v58  ;;  %v865_v48 = vpop.f32.mrf.mxu1 }
 0x112   : > { %3758 = vmatprep.mubr.msk.bf16.mxu0 %vm547_vm2, %v4352_v38  ;;  %v4745_v47 = vadd.f32 %v3549_v2, %v874_v22  ;;  %v866_v63 = vadd.f32 %v865_v48, %v4650_v5 }
 0x113   : > { %v1221_v36 = vpop.f32.mrf.mxu0  ;;  %v3518_v9 = vpop.f32.mrf.mxu1  ;;  %3721 = vmatmul.mubr.msk.bf16.gmra.mxu1 %vm547_vm2, %v4245_v54 }
 0x114   : > { %v4750_v18 = vadd.f32 %v1208_v4, %v866_v63  ;;  %v887_v43 = vadd.f32 %v3518_v9, %v4658_v35  ;;  %3724 = vmatprep.mubr.msk.bf16.mxu1 %vm547_vm2, %v3959_v41 }
 0x115   : > { %v3553_v31 = vpop.f32.mrf.mxu0  ;;  %v878_v58 = vpop.f32.mrf.mxu1 }
 0x116   : > { %v4755_v60 = vadd.f32 %v3552_v14, %v887_v43  ;;  %v879_v38 = vadd.f32 %v878_v58, %v4669_v45 }
 0x117   : > { %v1224_v28 = vpop.f32.mrf.mxu0  ;;  %v3519_v5 = vpop.f32.mrf.mxu1 }
 0x118   : > { %v4758_v21 = vadd.f32 %v1221_v36, %v879_v38  ;;  %v890_v40 = vadd.f32 %v3519_v5, %v4675_v10 }
 0x119   : > { %v3556_v54 = vpop.f32.mrf.mxu0  ;;  %3759 = vmatmul.mubr.msk.bf16.gmra.mxu0 %vm547_vm2, %v4356_v33  ;;  %v881_v35 = vpop.f32.mrf.mxu1 }
 0x11a   : > { %3762 = vmatprep.mubr.msk.bf16.mxu0 %vm547_vm2, %v4428_v15  ;;  %v4765_v41 = vadd.f32 %v3553_v31, %v890_v40  ;;  %v882_v42 = vadd.f32 %v881_v35, %v4681_v51 }
 0x11b   : > { %v1237_v27 = vpop.f32.mrf.mxu0  ;;  %v3522_v45 = vpop.f32.mrf.mxu1  ;;  %3725 = vmatmul.mubr.msk.bf16.gmra.mxu1 %vm547_vm2, %v4021_v16 }
 0x11c   : > { %v4770_v2 = vadd.f32 %v1224_v28, %v882_v42  ;;  %v903_v10 = vadd.f32 %v3522_v45, %v4685_v13  ;;  %3728 = vmatprep.mubr.msk.bf16.mxu1 %vm547_vm2, %v4056_v39 }
 0x11d   : > { %v3557_v29 = vpop.f32.mrf.mxu0  ;;  %v894_v33 = vpop.f32.mrf.mxu1 }
 0x11e   : > { %v4775_v8 = vadd.f32 %v3556_v54, %v903_v10  ;;  %v895_v15 = vadd.f32 %v894_v33, %v4691_v12 }
 0x11f   : > { %v1240_v4 = vpop.f32.mrf.mxu0  ;;  %v3523_v51 = vpop.f32.mrf.mxu1 }
 0x120   : > { %v4778_v46 = vadd.f32 %v1237_v27, %v895_v15  ;;  %v906_v22 = vadd.f32 %v3523_v51, %v4697_v57 }
 0x121   : > { %v3560_v16 = vpop.f32.mrf.mxu0  ;;  %3763 = vmatmul.mubr.msk.bf16.gmra.mxu0 %vm547_vm2, %v4376_v26  ;;  %v897_v13 = vpop.f32.mrf.mxu1 }
 0x122   : > { %3766 = vmatprep.mubr.msk.bf16.mxu0 %vm547_vm2, %v4446_v44  ;;  %v4785_v39 = vadd.f32 %v3557_v29, %v906_v22  ;;  %v898_v14 = vadd.f32 %v897_v13, %v4703_v7  ;;  %v296_v7 = vld [vmem:[%s3901_s29 + $0xd4] sm:$0x1] }
 0x123   : > { %v1253_v12 = vpop.f32.mrf.mxu0  ;;  %v3526_v48 = vpop.f32.mrf.mxu1  ;;  %3729 = vmatmul.mubr.msk.bf16.gmra.mxu1 %vm547_vm2, %v4114_v37 }
 0x124   : > { %v4790_v63 = vadd.f32 %v1240_v4, %v898_v14  ;;  %v919_v57 = vadd.f32 %v3526_v48, %v4616_v1  ;;  %3732 = vmatprep.mubr.msk.bf16.mxu1 %vm547_vm2, %v4153_v17  ;;  %v348_v1 = vunpack.c.l.bf16 %v4667_v53  ;;  %v349_v17 = vunpack.c.h.bf16 %v4667_v53 }
 0x125   : > { %v3561_v36 = vpop.f32.mrf.mxu0  ;;  %v910_v26 = vpop.f32.mrf.mxu1 }
 0x126   : > { %v4795_v9 = vadd.f32 %v3560_v16, %v919_v57  ;;  %v911_v44 = vadd.f32 %v910_v26, %v4622_v30  ;;  %v350_v30 = vunpack.c.l.bf16 %v296_v7  ;;  %v2385_v53 = vrot.slane %v348_v1, 2  ;;  %v5415_v57 = vld [vmem:[#allocation3_spill] sm:$0xff]  ;;  %v5416_v26 = vld [vmem:[#allocation2_spill] sm:$0xff] }
 0x127   : > { %v1256_v43 = vpop.f32.mrf.mxu0  ;;  %v3527_v31 = vpop.f32.mrf.mxu1  ;;  %v2176_v33 = vrot.slane %v348_v1, 1  ;;  %v2177_v15 = vrot.slane %v349_v17, 1 }
 0x128   : > { %v4799_v58 = vadd.f32 %v1253_v12, %v911_v44  ;;  %v922_v37 = vadd.f32 %v3527_v31, %v4628_v61  ;;  %v2388_v45 = vrot.slane %v350_v30, 2  ;;  %v5417_v31 = vld [vmem:[#allocation4_spill] sm:$0xff] }
 0x129   : > { %v3564_v38 = vpop.f32.mrf.mxu0  ;;  %3767 = vmatmul.mubr.msk.bf16.gmra.mxu0 %vm547_vm2, %v4398_v59  ;;  %v913_v28 = vpop.f32.mrf.mxu1 }
 0x12a   : > { %3770 = vmatprep.mubr.msk.bf16.mxu0 %vm547_vm2, %v4464_v50  ;;  %v4808_v5 = vadd.f32 %v3561_v36, %v922_v37  ;;  %v914_v40 = vadd.f32 %v913_v28, %v4632_v19  ;;  %v2386_v50 = vrot.slane %v349_v17, 2  ;;  %v5418_v28 = vld [vmem:[#allocation5_spill] sm:$0xff] }
 0x12b   : > { %v1269_v54 = vpop.f32.mrf.mxu0  ;;  %v3530_v35 = vpop.f32.mrf.mxu1  ;;  %3733 = vmatmul.mubr.msk.bf16.gmra.mxu1 %vm547_vm2, %v5405_v32 }
 0x12c   : > { %v4813_v61 = vadd.f32 %v1256_v43, %v914_v40  ;;  %v935_v59 = vadd.f32 %v3530_v35, %v4640_v62  ;;  %3736 = vmatprep.mubr.msk.bf16.mxu1 %vm547_vm2, %v4229_v34  ;;  %v2179_v34 = vrot.slane %v350_v30, 1  ;;  %v2387_v16 = vsel %vm973_vm3, %v2385_v53, %v2386_v50 }
 0x12d   : > { %v3565_v42 = vpop.f32.mrf.mxu0  ;;  %v926_v27 = vpop.f32.mrf.mxu1 }
 0x12e   : > { %v4818_v10 = vadd.f32 %v3564_v38, %v935_v59  ;;  %v927_v19 = vadd.f32 %v926_v27, %v4648_v49  ;;  %v2389_v49 = vsel %vm973_vm3, %v2386_v50, %v2388_v45  ;;  %v2180_v44 = vsel %vm416_vm1, %v2177_v15, %v2179_v34  ;;  %v5419_v59 = vld [vmem:[#allocation6_spill] sm:$0xff]  ;;  %v5420_v45 = vld [vmem:[#allocation7_spill] sm:$0xff] }
 0x12f   : > { %v1272_v29 = vpop.f32.mrf.mxu0  ;;  %v3531_v32 = vpop.f32.mrf.mxu1  ;;  %v2392_v43 = vpack.c.bf16 %v2389_v49, %v2387_v16  ;;  %v5422_v16 = vld [vmem:[#allocation9_spill] sm:$0xff] }
 0x130   : > { %v4821_v4 = vadd.f32 %v1269_v54, %v927_v19  ;;  %v938_v62 = vadd.f32 %v3531_v32, %v4654_v56  ;;  %v5421_v32 = vld [vmem:[#allocation8_spill] sm:$0xff] }
 0x131   : > { %v3568_v51 = vpop.f32.mrf.mxu0  ;;  %3771 = vmatmul.mubr.msk.bf16.gmra.mxu0 %vm547_vm2, %v4488_v55  ;;  %v929_v22 = vpop.f32.mrf.mxu1  ;;  %v2178_v55 = vsel %vm416_vm1, %v2176_v33, %v2177_v15 }
 0x132   : > { %3774 = vmatprep.mubr.msk.bf16.mxu0 %vm547_vm2, %v4496_v3  ;;  %v4830_v13 = vadd.f32 %v3565_v42, %v938_v62  ;;  %v930_v14 = vadd.f32 %v929_v22, %v4656_v25  ;;  %v2183_v1 = vpack.c.bf16 %v2180_v44, %v2178_v55  ;;  %v5423_v55 = vld [vmem:[#allocation10_spill] sm:$0xff] }
 0x133   : > { %v1285_v12 = vpop.f32.mrf.mxu0  ;;  %v3534_v48 = vpop.f32.mrf.mxu1  ;;  %3737 = vmatmul.mubr.msk.bf16.gmra.mxu1 %vm547_vm2, %v4260_v23 }
 0x134   : > { %v4836_v56 = vadd.f32 %v1272_v29, %v930_v14  ;;  %v951_v36 = vadd.f32 %v3534_v48, %v5415_v57  ;;  %3740 = vmatprep.mubr.msk.bf16.mxu1 %vm547_vm2, %v5416_v26 }
 0x135   : > { %v3569_v3 = vpop.f32.mrf.mxu0  ;;  %v942_v7 = vpop.f32.mrf.mxu1 }
 0x136   : > { %v4842_v25 = vadd.f32 %v3568_v51, %v951_v36  ;;  %v943_v37 = vadd.f32 %v942_v7, %v5417_v31 }
 0x137   : > { %v1288_v38 = vpop.f32.mrf.mxu0  ;;  %v3535_v23 = vpop.f32.mrf.mxu1 }
 0x138   : > { %v4845_v17 = vadd.f32 %v1285_v12, %v943_v37  ;;  %v954_v30 = vadd.f32 %v3535_v23, %v5418_v28 }
 0x139   : > { %v3572_v40 = vpop.f32.mrf.mxu0  ;;  %3775 = vmatmul.mubr.msk.bf16.gmra.mxu0 %vm547_vm2, %v2392_v43  ;;  %v945_v54 = vpop.f32.mrf.mxu1 }
 0x13a   : > { %v4849_v35 = vadd.f32 %v3569_v3, %v954_v30  ;;  %v946_v42 = vadd.f32 %v945_v54, %v5419_v59 }
 0x13b   : > { %v1301_v53 = vpop.f32.mrf.mxu0  ;;  %v3538_v50 = vpop.f32.mrf.mxu1  ;;  %3741 = vmatmul.mubr.msk.bf16.gmra.mxu1 %vm547_vm2, %v2183_v1 }
 0x13c   : > { %v4853_v27 = vadd.f32 %v1288_v38, %v946_v42  ;;  %v967_v19 = vadd.f32 %v3538_v50, %v5420_v45 }
 0x13d   : > { %v3573_v29 = vpop.f32.mrf.mxu0  ;;  %v958_v33 = vpop.f32.mrf.mxu1 }
 0x13e   : > { %v4856_v15 = vadd.f32 %v3572_v40, %v967_v19  ;;  %v959_v62 = vadd.f32 %v958_v33, %v5421_v32 }
 0x13f   : > { %v1304_v51 = vpop.f32.mrf.mxu0  ;;  %v3539_v34 = vpop.f32.mrf.mxu1 }
 0x140   : > { %v4859_v22 = vadd.f32 %v1301_v53, %v959_v62  ;;  %v970_v49 = vadd.f32 %v3539_v34, %v5422_v16 }
 0x141   : > { %v3612_v14 = vpop.f32.mrf.mxu0  ;;  %v961_v12 = vpop.f32.mrf.mxu1 }
 0x142   : > { %v4862_v48 = vadd.f32 %v3573_v29, %v970_v49  ;;  %v962_v57 = vadd.f32 %v961_v12, %v5423_v55 }
 0x143   : > { %v1603_v36 = vpop.f32.mrf.mxu0  ;;  %v3578_v3 = vpop.f32.mrf.mxu1 }
 0x144   : > { %v4865_v26 = vadd.f32 %v1304_v51, %v962_v57  ;;  %v1520_v44 = vadd.f32 %v3578_v3, %v4717_v52 }
 0x145   : > { %v3613_v43 = vpop.f32.mrf.mxu0  ;;  %v1391_v7 = vpop.f32.mrf.mxu1 }
 0x146   : > { %v4868_v31 = vadd.f32 %v3612_v14, %v1520_v44  ;;  %v1518_v37 = vadd.f32 %v1391_v7, %v4719_v24 }
 0x147   : > { %v1606_v38 = vpop.f32.mrf.mxu0  ;;  %v3579_v23 = vpop.f32.mrf.mxu1 }
 0x148   : > { %v4871_v1 = vadd.f32 %v1603_v36, %v1518_v37  ;;  %v1521_v28 = vadd.f32 %v3579_v23, %v4725_v20 }
 0x149   : > { %v3616_v30 = vpop.f32.mrf.mxu0  ;;  %v1394_v40 = vpop.f32.mrf.mxu1 }
 0x14a   : > { %v4874_v54 = vadd.f32 %v3613_v43, %v1521_v28  ;;  %v1519_v59 = vadd.f32 %v1394_v40, %v4730_v6 }
 0x14b   : > { %v1619_v42 = vpop.f32.mrf.mxu0  ;;  %v3582_v52 = vpop.f32.mrf.mxu1 }
 0x14c   : > { %v4877_v53 = vadd.f32 %v1606_v38, %v1519_v59  ;;  %v1524_v50 = vadd.f32 %v3582_v52, %v4735_v0 }
 0x14d   : > { %v3617_v45 = vpop.f32.mrf.mxu0  ;;  %v1407_v24 = vpop.f32.mrf.mxu1 }
 0x14e   : > { %v4880_v19 = vadd.f32 %v3616_v30, %v1524_v50  ;;  %v1522_v29 = vadd.f32 %v1407_v24, %v4738_v11 }
 0x14f   : > { %v1622_v33 = vpop.f32.mrf.mxu0  ;;  %v3583_v20 = vpop.f32.mrf.mxu1 }
 0x150   : > { %v4883_v32 = vadd.f32 %v1619_v42, %v1522_v29  ;;  %v1525_v62 = vadd.f32 %v3583_v20, %v4745_v47 }
 0x151   : > { %v3620_v51 = vpop.f32.mrf.mxu0  ;;  %v1410_v6 = vpop.f32.mrf.mxu1 }
 0x152   : > { %v4886_v34 = vadd.f32 %v3617_v45, %v1525_v62  ;;  %v1523_v16 = vadd.f32 %v1410_v6, %v4750_v18 }
 0x153   : > { %v1635_v49 = vpop.f32.mrf.mxu0  ;;  %v3586_v0 = vpop.f32.mrf.mxu1 }
 0x154   : > { %v4889_v14 = vadd.f32 %v1622_v33, %v1523_v16  ;;  %v1528_v12 = vadd.f32 %v3586_v0, %v4755_v60 }
 0x155   : > { %v3621_v55 = vpop.f32.mrf.mxu0  ;;  %v1423_v11 = vpop.f32.mrf.mxu1 }
 0x156   : > { %v4892_v57 = vadd.f32 %v3620_v51, %v1528_v12  ;;  %v1526_v36 = vadd.f32 %v1423_v11, %v4758_v21 }
 0x157   : > { %v1638_v3 = vpop.f32.mrf.mxu0  ;;  %v3587_v47 = vpop.f32.mrf.mxu1 }
 0x158   : > { %v4895_v44 = vadd.f32 %v1635_v49, %v1526_v36  ;;  %v1529_v43 = vadd.f32 %v3587_v47, %v4765_v41 }
 0x159   : > { %v3624_v7 = vpop.f32.mrf.mxu0  ;;  %v1426_v18 = vpop.f32.mrf.mxu1 }
 0x15a   : > { %v4898_v37 = vadd.f32 %v3621_v55, %v1529_v43  ;;  %v1527_v38 = vadd.f32 %v1426_v18, %v4770_v2 }
 0x15b   : > { %v1651_v23 = vpop.f32.mrf.mxu0  ;;  %v3590_v60 = vpop.f32.mrf.mxu1 }
 0x15c   : > { %v4901_v28 = vadd.f32 %v1638_v3, %v1527_v38  ;;  %v1532_v30 = vadd.f32 %v3590_v60, %v4775_v8 }
 0x15d   : > { %v3625_v40 = vpop.f32.mrf.mxu0  ;;  %v1439_v21 = vpop.f32.mrf.mxu1 }
 0x15e   : > { %5424 = vst [vmem:[#allocation3_spill] sm:$0xff] %v4901_v28  ;;  %v4904_v59 = vadd.f32 %v3624_v7, %v1532_v30  ;;  %v1530_v42 = vadd.f32 %v1439_v21, %v4778_v46 }
 0x15f   : > { %v1654_v52 = vpop.f32.mrf.mxu0  ;;  %v3591_v41 = vpop.f32.mrf.mxu1 }
 0x160   : > { %v4907_v50 = vadd.f32 %v1651_v23, %v1530_v42  ;;  %v1533_v45 = vadd.f32 %v3591_v41, %v4785_v39 }
 0x161   : > { %v3628_v24 = vpop.f32.mrf.mxu0  ;;  %v1442_v2 = vpop.f32.mrf.mxu1 }
 0x162   : > { %v4910_v29 = vadd.f32 %v3625_v40, %v1533_v45  ;;  %v1531_v33 = vadd.f32 %v1442_v2, %v4790_v63 }
 0x163   : > { %v1667_v20 = vpop.f32.mrf.mxu0  ;;  %v3594_v8 = vpop.f32.mrf.mxu1 }
 0x164   : > { %v4913_v62 = vadd.f32 %v1654_v52, %v1531_v33  ;;  %v1536_v51 = vadd.f32 %v3594_v8, %v4795_v9 }
 0x165   : > { %v3629_v6 = vpop.f32.mrf.mxu0  ;;  %v1455_v46 = vpop.f32.mrf.mxu1 }
 0x166   : > { %v4916_v16 = vadd.f32 %v3628_v24, %v1536_v51  ;;  %v1534_v49 = vadd.f32 %v1455_v46, %v4799_v58 }
 0x167   : > { %v1670_v0 = vpop.f32.mrf.mxu0  ;;  %v3595_v39 = vpop.f32.mrf.mxu1 }
 0x168   : > { %v4919_v12 = vadd.f32 %v1667_v20, %v1534_v49  ;;  %v1537_v55 = vadd.f32 %v3595_v39, %v4808_v5 }
 0x169   : > { %v3632_v11 = vpop.f32.mrf.mxu0  ;;  %v1458_v63 = vpop.f32.mrf.mxu1 }
 0x16a   : > { %v4922_v36 = vadd.f32 %v3629_v6, %v1537_v55  ;;  %v1535_v3 = vadd.f32 %v1458_v63, %v4813_v61 }
 0x16b   : > { %v1683_v47 = vpop.f32.mrf.mxu0  ;;  %v3598_v9 = vpop.f32.mrf.mxu1 }
 0x16c   : > { %v4925_v43 = vadd.f32 %v1670_v0, %v1535_v3  ;;  %v1540_v7 = vadd.f32 %v3598_v9, %v4818_v10 }
 0x16d   : > { %v3633_v18 = vpop.f32.mrf.mxu0  ;;  %v1471_v58 = vpop.f32.mrf.mxu1 }
 0x16e   : > { %v4928_v38 = vadd.f32 %v3632_v11, %v1540_v7  ;;  %v1538_v23 = vadd.f32 %v1471_v58, %v4821_v4 }
 0x16f   : > { %v1686_v60 = vpop.f32.mrf.mxu0  ;;  %v3599_v5 = vpop.f32.mrf.mxu1 }
 0x170   : > { %v4931_v30 = vadd.f32 %v1683_v47, %v1538_v23  ;;  %v1541_v40 = vadd.f32 %v3599_v5, %v4830_v13 }
 0x171   : > { %v3636_v21 = vpop.f32.mrf.mxu0  ;;  %v1474_v61 = vpop.f32.mrf.mxu1 }
 0x172   : > { %v4934_v42 = vadd.f32 %v3633_v18, %v1541_v40  ;;  %v1539_v52 = vadd.f32 %v1474_v61, %v4836_v56 }
 0x173   : > { %v1699_v41 = vpop.f32.mrf.mxu0  ;;  %v3602_v10 = vpop.f32.mrf.mxu1 }
 0x174   : > { %v4937_v45 = vadd.f32 %v1686_v60, %v1539_v52  ;;  %v1544_v24 = vadd.f32 %v3602_v10, %v4842_v25 }
 0x175   : > { %v3637_v2 = vpop.f32.mrf.mxu0  ;;  %v1487_v4 = vpop.f32.mrf.mxu1 }
 0x176   : > { %v4940_v33 = vadd.f32 %v3636_v21, %v1544_v24  ;;  %v1542_v20 = vadd.f32 %v1487_v4, %v4845_v17 }
 0x177   : > { %v1702_v8 = vpop.f32.mrf.mxu0  ;;  %v3603_v13 = vpop.f32.mrf.mxu1 }
 0x178   : > { %v4943_v51 = vadd.f32 %v1699_v41, %v1542_v20  ;;  %v1545_v6 = vadd.f32 %v3603_v13, %v4849_v35 }
 0x179   : > { %v3640_v46 = vpop.f32.mrf.mxu0  ;;  %v1490_v56 = vpop.f32.mrf.mxu1 }
 0x17a   : > { %v4946_v49 = vadd.f32 %v3637_v2, %v1545_v6  ;;  %v1543_v0 = vadd.f32 %v1490_v56, %v4853_v27 }
 0x17b   : > { %v1715_v39 = vpop.f32.mrf.mxu0  ;;  %v3606_v25 = vpop.f32.mrf.mxu1 }
 0x17c   : > { %v4949_v55 = vadd.f32 %v1702_v8, %v1543_v0  ;;  %v1548_v11 = vadd.f32 %v3606_v25, %v4856_v15 }
 0x17d   : > { %v3641_v63 = vpop.f32.mrf.mxu0  ;;  %v1503_v17 = vpop.f32.mrf.mxu1 }
 0x17e   : > { %v4952_v3 = vadd.f32 %v3640_v46, %v1548_v11  ;;  %v1546_v47 = vadd.f32 %v1503_v17, %v4859_v22 }
 0x17f   : > { %v1718_v9 = vpop.f32.mrf.mxu0  ;;  %v3607_v35 = vpop.f32.mrf.mxu1 }
 0x180   : > { %v4955_v7 = vadd.f32 %v1715_v39, %v1546_v47  ;;  %v1549_v18 = vadd.f32 %v3607_v35, %v4862_v48 }
 0x181   : > { %v4958_v58 = vpop.f32.mrf.mxu0  ;;  %v1506_v27 = vpop.f32.mrf.mxu1 }
 0x182   : > { %v4960_v23 = vadd.f32 %v3641_v63, %v1549_v18  ;;  %v1547_v60 = vadd.f32 %v1506_v27, %v4865_v26 }
 0x183   : > { %v4963_v15 = vpop.f32.mrf.mxu0  ;;  %v4965_v5 = vpop.f32.mrf.mxu1 }
 0x184   : > { %v4967_v40 = vadd.f32 %v1718_v9, %v1547_v60 }
 0x185   : > { %v4969_v22 = vpop.f32.mrf.mxu0  ;;  %v4971_v21 = vpop.f32.mrf.mxu1 }
 0x187   : > { %v4973_v61 = vpop.f32.mrf.mxu0  ;;  %v4975_v48 = vpop.f32.mrf.mxu1 }
 0x189   : > { %v4977_v52 = vpop.f32.mrf.mxu0  ;;  %v4979_v41 = vpop.f32.mrf.mxu1 }
 0x18b   : > { %v4981_v10 = vpop.f32.mrf.mxu0  ;;  %v4983_v26 = vpop.f32.mrf.mxu1 }
 0x18d   : > { %v4985_v24 = vpop.f32.mrf.mxu0  ;;  %v4987_v2 = vpop.f32.mrf.mxu1 }
 0x18f   : > { %v4989_v4 = vpop.f32.mrf.mxu0  ;;  %v4991_v20 = vpop.f32.mrf.mxu1 }
 0x191   : > { %v3688_v8 = vpop.f32.mrf.mxu0  ;;  %v4993_v13 = vpop.f32.mrf.mxu1 }
 0x193   : > { %v4995_v6 = vpop.f32.mrf.mxu0  ;;  %v3654_v46 = vpop.f32.mrf.mxu1 }
 0x194   : > { %v1949_v56 = vadd.f32 %v3654_v46, %v4892_v57 }
 0x195   : > { %v3689_v0 = vpop.f32.mrf.mxu0  ;;  %v4998_v39 = vpop.f32.mrf.mxu1 }
 0x196   : > { %v5000_v25 = vadd.f32 %v3688_v8, %v1949_v56 }
 0x197   : > { %v5002_v11 = vpop.f32.mrf.mxu0  ;;  %v3655_v63 = vpop.f32.mrf.mxu1 }
 0x198   : > { %5425 = vst [vmem:[#allocation2_spill] sm:$0xff] %v5000_v25  ;;  %5426 = vst [vmem:[#allocation4_spill] sm:$0xff] %v5002_v11  ;;  %v1950_v17 = vadd.f32 %v3655_v63, %v4898_v37 }
 0x199   : > { %v3692_v47 = vpop.f32.mrf.mxu0  ;;  %v5005_v9 = vpop.f32.mrf.mxu1 }
 0x19a   : > { %5427 = vst [vmem:[#allocation5_spill] sm:$0xff] %v5005_v9  ;;  %v5007_v35 = vadd.f32 %v3689_v0, %v1950_v17 }
 0x19b   : > { %v2062_v18 = vpop.f32.mrf.mxu0  ;;  %v3658_v27 = vpop.f32.mrf.mxu1 }
 0x19c   : > { %5428 = vst [vmem:[#allocation6_spill] sm:$0xff] %v5007_v35  ;;  %v1953_v60 = vadd.f32 %v3658_v27, %v4904_v59 }
 0x19d   : > { %v3693_v57 = vpop.f32.mrf.mxu0  ;;  %v1860_v46 = vpop.f32.mrf.mxu1 }
 0x19e   : > { %v5010_v28 = vadd.f32 %v3692_v47, %v1953_v60  ;;  %v1951_v8 = vadd.f32 %v1860_v46, %v4907_v50 }
 0x19f   : > { %v2065_v56 = vpop.f32.mrf.mxu0  ;;  %v3659_v25 = vpop.f32.mrf.mxu1 }
 0x1a0   : > { %v5013_v11 = vadd.f32 %v2062_v18, %v1951_v8  ;;  %v1954_v37 = vadd.f32 %v3659_v25, %v4910_v29 }
 0x1a1   : > { %v3696_v63 = vpop.f32.mrf.mxu0  ;;  %v1863_v9 = vpop.f32.mrf.mxu1 }
 0x1a2   : > { %v5016_v0 = vadd.f32 %v3693_v57, %v1954_v37  ;;  %v1952_v17 = vadd.f32 %v1863_v9, %v4913_v62 }
 0x1a3   : > { %v2078_v35 = vpop.f32.mrf.mxu0  ;;  %v3662_v59 = vpop.f32.mrf.mxu1 }
 0x1a4   : > { %v5019_v27 = vadd.f32 %v2065_v56, %v1952_v17  ;;  %v1957_v47 = vadd.f32 %v3662_v59, %v4916_v16 }
 0x1a5   : > { %v3697_v60 = vpop.f32.mrf.mxu0  ;;  %v1876_v50 = vpop.f32.mrf.mxu1 }
 0x1a6   : > { %v5022_v46 = vadd.f32 %v3696_v63, %v1957_v47  ;;  %v1955_v18 = vadd.f32 %v1876_v50, %v4919_v12 }
 0x1a7   : > { %v2081_v8 = vpop.f32.mrf.mxu0  ;;  %v3663_v29 = vpop.f32.mrf.mxu1 }
 0x1a8   : > { %v5025_v25 = vadd.f32 %v2078_v35, %v1955_v18  ;;  %v1958_v57 = vadd.f32 %v3663_v29, %v4922_v36 }
 0x1a9   : > { %v3700_v37 = vpop.f32.mrf.mxu0  ;;  %v1879_v62 = vpop.f32.mrf.mxu1 }
 0x1aa   : > { %v5028_v9 = vadd.f32 %v3697_v60, %v1958_v57  ;;  %v1956_v56 = vadd.f32 %v1879_v62, %v4925_v43 }
 0x1ab   : > { %v2094_v17 = vpop.f32.mrf.mxu0  ;;  %v3666_v16 = vpop.f32.mrf.mxu1 }
 0x1ac   : > { %v5031_v59 = vadd.f32 %v2081_v8, %v1956_v56  ;;  %v1961_v63 = vadd.f32 %v3666_v16, %v4928_v38 }
 0x1ad   : > { %v3701_v47 = vpop.f32.mrf.mxu0  ;;  %v1892_v12 = vpop.f32.mrf.mxu1 }
 0x1ae   : > { %v5034_v50 = vadd.f32 %v3700_v37, %v1961_v63  ;;  %v1959_v35 = vadd.f32 %v1892_v12, %v4931_v30 }
 0x1af   : > { %v2097_v18 = vpop.f32.mrf.mxu0  ;;  %v3667_v36 = vpop.f32.mrf.mxu1 }
 0x1b0   : > { %v5037_v29 = vadd.f32 %v2094_v17, %v1959_v35  ;;  %v1962_v60 = vadd.f32 %v3667_v36, %v4934_v42 }
 0x1b1   : > { %v3704_v57 = vpop.f32.mrf.mxu0  ;;  %v1895_v43 = vpop.f32.mrf.mxu1 }
 0x1b2   : > { %v5040_v62 = vadd.f32 %v3701_v47, %v1962_v60  ;;  %v1960_v8 = vadd.f32 %v1895_v43, %v4937_v45 }
 0x1b3   : > { %v2110_v56 = vpop.f32.mrf.mxu0  ;;  %v3670_v38 = vpop.f32.mrf.mxu1 }
 0x1b4   : > { %v5043_v16 = vadd.f32 %v2097_v18, %v1960_v8  ;;  %v1965_v37 = vadd.f32 %v3670_v38, %v4940_v33 }
 0x1b5   : > { %v3705_v63 = vpop.f32.mrf.mxu0  ;;  %v1908_v30 = vpop.f32.mrf.mxu1 }
 0x1b6   : > { %v5046_v12 = vadd.f32 %v3704_v57, %v1965_v37  ;;  %v1963_v17 = vadd.f32 %v1908_v30, %v4943_v51 }
 0x1b7   : > { %v2113_v35 = vpop.f32.mrf.mxu0  ;;  %v3671_v42 = vpop.f32.mrf.mxu1 }
 0x1b8   : > { %v5049_v36 = vadd.f32 %v2110_v56, %v1963_v17  ;;  %v1966_v47 = vadd.f32 %v3671_v42, %v4946_v49  ;;  %v1941_v56 = vadd.f32 %v4965_v5, %v4868_v31  ;;  %v1942_v31 = vadd.f32 %v4975_v48, %v4874_v54 }
 0x1b9   : > { %v3708_v60 = vpop.f32.mrf.mxu0  ;;  %v1911_v45 = vpop.f32.mrf.mxu1 }
 0x1ba   : > { %v5052_v43 = vadd.f32 %v3705_v63, %v1966_v47  ;;  %v1964_v18 = vadd.f32 %v1911_v45, %v4949_v55  ;;  %v1939_v55 = vadd.f32 %v4971_v21, %v4871_v1  ;;  %v2143_v45 = vadd.f32 %v4958_v58, %v1941_v56  ;;  %v5082_v58 = vld [vmem:[%s5311_s2] ss:$0 sm:$0xff] }
 0x1bb   : > { %v2126_v8 = vpop.f32.mrf.mxu0  ;;  %v3674_v33 = vpop.f32.mrf.mxu1  ;;  %v2144_v48 = vadd.f32 %v4969_v22, %v1942_v31  ;;  %v1943_v56 = vadd.f32 %v4987_v2, %v4883_v32  ;;  %v1946_v22 = vadd.f32 %v4991_v20, %v4886_v34  ;;  %v1944_v32 = vadd.f32 %v4993_v13, %v4889_v14 }
 0x1bc   : > { %v5055_v38 = vadd.f32 %v2113_v35, %v1964_v18  ;;  %v1969_v57 = vadd.f32 %v3674_v33, %v4952_v3  ;;  %v2141_v1 = vadd.f32 %v4963_v15, %v1939_v55  ;;  %v1940_v33 = vadd.f32 %v4979_v41, %v4877_v53 }
 0x1bd   : > { %v3709_v37 = vpop.f32.mrf.mxu0  ;;  %v1924_v51 = vpop.f32.mrf.mxu1  ;;  %v1945_v15 = vadd.f32 %v4983_v26, %v4880_v19  ;;  %v1947_v26 = vadd.f32 %v4998_v39, %v4895_v44  ;;  %v2148_v13 = vadd.f32 %v4985_v24, %v1946_v22 }
 0x1be   : > { %v5060_v30 = vadd.f32 %v3708_v60, %v1969_v57  ;;  %v1967_v49 = vadd.f32 %v1924_v51, %v4955_v7 }
 0x1bf   : > { %v2129_v17 = vpop.f32.mrf.mxu0  ;;  %v3675_v63 = vpop.f32.mrf.mxu1  ;;  %v2147_v34 = vadd.f32 %v4977_v52, %v1945_v15  ;;  %v2146_v52 = vadd.f32 %v4989_v4, %v1944_v32 }
 0x1c0   : > { %v5065_v42 = vadd.f32 %v2126_v8, %v1967_v49  ;;  %v1970_v35 = vadd.f32 %v3675_v63, %v4960_v23  ;;  %v2142_v63 = vadd.f32 %v4973_v61, %v1940_v33 }
 0x1c1   : > { %v3748_v47 = vpop.f32.mrf.mxu0  ;;  %v1927_v3 = vpop.f32.mrf.mxu1 }
 0x1c2   : > { %v5071_v5 = vadd.f32 %v3709_v37, %v1970_v35  ;;  %v1968_v7 = vadd.f32 %v1927_v3, %v4967_v40  ;;  %v2145_v3 = vadd.f32 %v4981_v10, %v1943_v56 }
 0x1c3   : > { %v2435_v60 = vpop.f32.mrf.mxu0  ;;  %v3714_v18 = vpop.f32.mrf.mxu1 }
 0x1c4   : > { %v5075_v21 = vadd.f32 %v2129_v17, %v1968_v7  ;;  %v2355_v8 = vadd.f32 %v3714_v18, %v2143_v45  ;;  %v5429_v18 = vld [vmem:[#allocation3_spill] sm:$0xff] }
 0x1c5   : > { %v3749_v23 = vpop.f32.mrf.mxu0  ;;  %v2226_v54 = vpop.f32.mrf.mxu1 }
 0x1c6   : > { %v2564_v40 = vadd.f32 %v3748_v47, %v2355_v8  ;;  %v2353_v57 = vadd.f32 %v2226_v54, %v2141_v1  ;;  %v5430_v1 = vld [vmem:[#allocation5_spill] sm:$0xff] }
 0x1c7   : > { %v2438_v37 = vpop.f32.mrf.mxu0  ;;  %v3715_v51 = vpop.f32.mrf.mxu1  ;;  %v1948_v10 = vadd.f32 %v5430_v1, %v5429_v18 }
 0x1c8   : > { %v2603_v53 = vadd.f32 %v5082_v58, %v2564_v40  ;;  %v2562_v41 = vadd.f32 %v2435_v60, %v2353_v57  ;;  %v2356_v49 = vadd.f32 %v3715_v51, %v2144_v48  ;;  %v2149_v60 = vadd.f32 %v4995_v6, %v1947_v26 }
 0x1c9   : > { %v3752_v17 = vpop.f32.mrf.mxu0  ;;  %v2229_v19 = vpop.f32.mrf.mxu1 }
 0x1ca   : > { %v3289_v2 = vpack.c.bf16 %v2603_v53, %v2603_v53  ;;  %v2601_v61 = vadd.f32 %v5082_v58, %v2562_v41  ;;  %v2565_v20 = vadd.f32 %v3749_v23, %v2356_v49  ;;  %v2354_v35 = vadd.f32 %v2229_v19, %v2142_v63 }
 0x1cb   : > { %v2451_v55 = vpop.f32.mrf.mxu0  ;;  %v3718_v47 = vpop.f32.mrf.mxu1  ;;  %v2798_v33 = vsel %vm2794_vm5, %v2603_v53, 0.0  ;;  %v2868_v57 = vmul.f32 %v2603_v53, %v2603_v53 }
 0x1cc   : > { %2764 = vst.msk [vmem:[%s5097_s24 + $0x8] sm:$0xf] %vm2761_vm4, %v3289_v2  ;;  %v3287_v45 = vpack.c.bf16 %v2601_v61, %v2601_v61  ;;  %v2604_v44 = vadd.f32 %v5082_v58, %v2565_v20  ;;  %v2563_v39 = vadd.f32 %v2438_v37, %v2354_v35  ;;  %v2359_v31 = vadd.f32 %v3718_v47, %v2147_v34  ;;  %v5431_v20 = vld [vmem:[#allocation4_spill] sm:$0xff] }
 0x1cd   : > { %v3753_v14 = vpop.f32.mrf.mxu0  ;;  %v2242_v7 = vpop.f32.mrf.mxu1  ;;  %v2866_v24 = vmul.f32 %v2601_v61, %v2601_v61  ;;  %v2795_v51 = vsel %vm2794_vm5, %v2601_v61, 0.0  ;;  %v2150_v35 = vadd.f32 %v5431_v20, %v1948_v10 }
 0x1ce   : > { %2762 = vst.msk [vmem:[%s5097_s24] sm:$0xf] %vm2761_vm4, %v3287_v45  ;;  %v2357_v8 = vadd.f32 %v2242_v7, %v2145_v3  ;;  %v3290_v54 = vpack.c.bf16 %v2604_v44, %v2604_v44  ;;  %v2602_v48 = vadd.f32 %v5082_v58, %v2563_v39  ;;  %v2568_v37 = vadd.f32 %v3752_v17, %v2359_v31 }
 0x1cf   : > { %v2454_v23 = vpop.f32.mrf.mxu0  ;;  %v3719_v40 = vpop.f32.mrf.mxu1  ;;  %v2898_v26 = vsel %vm2794_vm5, %v2866_v24, 0.0  ;;  %v2869_v2 = vmul.f32 %v2604_v44, %v2604_v44  ;;  %v2800_v39 = vsel %vm2794_vm5, %v2604_v44, 0.0 }
 0x1d0   : > { %v2566_v4 = vadd.f32 %v2451_v55, %v2357_v8  ;;  %v2360_v6 = vadd.f32 %v3719_v40, %v2148_v13  ;;  %2765 = vst.msk [vmem:[%s5097_s24 + $0xc] sm:$0xf] %vm2761_vm4, %v3290_v54  ;;  %v3288_v56 = vpack.c.bf16 %v2602_v48, %v2602_v48  ;;  %v2796_v41 = vsel %vm2794_vm5, %v2602_v48, 0.0 }
 0x1d1   : > { %v3756_v15 = vpop.f32.mrf.mxu0  ;;  %v2867_v49 = vmul.f32 %v2602_v48, %v2602_v48  ;;  %v2245_v63 = vpop.f32.mrf.mxu1  ;;  %v2797_v22 = vadd.f32 %v2796_v41, %v2795_v51  ;;  %v2607_v19 = vadd.f32 %v5082_v58, %v2568_v37  ;;  %v5432_v48 = vld [vmem:[#allocation2_spill] sm:$0xff] }
 0x1d2   : > { %v2605_v32 = vadd.f32 %v5082_v58, %v2566_v4  ;;  %v2569_v53 = vadd.f32 %v3753_v14, %v2360_v6  ;;  %2763 = vst.msk [vmem:[%s5097_s24 + $0x4] sm:$0xf] %vm2761_vm4, %v3288_v56  ;;  %v2358_v55 = vadd.f32 %v2245_v63, %v2146_v52  ;;  %v2901_v14 = vsel %vm2794_vm5, %v2868_v57, 0.0 }
 0x1d3   : > { %v2467_v17 = vpop.f32.mrf.mxu0  ;;  %v2899_v61 = vsel %vm2794_vm5, %v2867_v49, 0.0  ;;  %v3722_v34 = vpop.f32.mrf.mxu1  ;;  %v2799_v47 = vadd.f32 %v2798_v33, %v2797_v22  ;;  %v3293_v45 = vpack.c.bf16 %v2607_v19, %v2607_v19  ;;  %v2903_v33 = vsel %vm2794_vm5, %v2869_v2, 0.0 }
 0x1d4   : > { %v2900_v3 = vadd.f32 %v2899_v61, %v2898_v26  ;;  %v3291_v31 = vpack.c.bf16 %v2605_v32, %v2605_v32  ;;  %v2870_v7 = vmul.f32 %v2605_v32, %v2605_v32  ;;  %v2608_v52 = vadd.f32 %v5082_v58, %v2569_v53 }
 0x1d5   : > { %v3757_v13 = vpop.f32.mrf.mxu0  ;;  %v2258_v18 = vpop.f32.mrf.mxu1  ;;  %2768 = vst.msk [vmem:[%s5097_s24 + $0x18] sm:$0xf] %vm2761_vm4, %v3293_v45  ;;  %v2801_v8 = vadd.f32 %v2800_v39, %v2799_v47  ;;  %v2567_v24 = vadd.f32 %v2454_v23, %v2358_v55  ;;  %v2802_v54 = vsel %vm2794_vm5, %v2605_v32, 0.0  ;;  %v2363_v44 = vadd.f32 %v3722_v34, %v5432_v48 }
 0x1d6   : > { %v2902_v1 = vadd.f32 %v2901_v14, %v2900_v3  ;;  %2766 = vst.msk [vmem:[%s5097_s24 + $0x10] sm:$0xf] %vm2761_vm4, %v3291_v31  ;;  %v2361_v40 = vadd.f32 %v2258_v18, %v2149_v60  ;;  %v2872_v37 = vmul.f32 %v2607_v19, %v2607_v19  ;;  %v3294_v51 = vpack.c.bf16 %v2608_v52, %v2608_v52  ;;  %v5433_v60 = vld [vmem:[#allocation6_spill] sm:$0xff] }
 0x1d7   : > { %v2470_v10 = vpop.f32.mrf.mxu0  ;;  %v3723_v57 = vpop.f32.mrf.mxu1  ;;  %v2803_v4 = vadd.f32 %v2802_v54, %v2801_v8  ;;  %v2905_v41 = vsel %vm2794_vm5, %v2870_v7, 0.0  ;;  %v2606_v23 = vadd.f32 %v5082_v58, %v2567_v24  ;;  %v2572_v49 = vadd.f32 %v3756_v15, %v2363_v44 }
 0x1d8   : > { %v2904_v6 = vadd.f32 %v2903_v33, %v2902_v1  ;;  %v2570_v63 = vadd.f32 %v2467_v17, %v2361_v40  ;;  %v2806_v53 = vsel %vm2794_vm5, %v2607_v19, 0.0  ;;  %2769 = vst.msk [vmem:[%s5097_s24 + $0x1c] sm:$0xf] %vm2761_vm4, %v3294_v51  ;;  %v2364_v26 = vadd.f32 %v3723_v57, %v5433_v60 }
 0x1d9   : > { %v3760_v56 = vpop.f32.mrf.mxu0  ;;  %v2261_v22 = vpop.f32.mrf.mxu1  ;;  %v2873_v55 = vmul.f32 %v2608_v52, %v2608_v52  ;;  %v3292_v34 = vpack.c.bf16 %v2606_v23, %v2606_v23  ;;  %v2804_v20 = vsel %vm2794_vm5, %v2606_v23, 0.0  ;;  %v2871_v47 = vmul.f32 %v2606_v23, %v2606_v23 }
 0x1da   : > { %v2906_v32 = vadd.f32 %v2905_v41, %v2904_v6  ;;  %v2362_v2 = vadd.f32 %v2261_v22, %v2150_v35  ;;  %v2805_v45 = vadd.f32 %v2804_v20, %v2803_v4  ;;  %v2611_v15 = vadd.f32 %v5082_v58, %v2572_v49 }
 0x1db   : > { %v2483_v61 = vpop.f32.mrf.mxu0  ;;  %v3726_v3 = vpop.f32.mrf.mxu1  ;;  %v2609_v17 = vadd.f32 %v5082_v58, %v2570_v63  ;;  %v2573_v19 = vadd.f32 %v3757_v13, %v2364_v26  ;;  %v2909_v39 = vsel %vm2794_vm5, %v2872_v37, 0.0  ;;  %2767 = vst.msk [vmem:[%s5097_s24 + $0x14] sm:$0xf] %vm2761_vm4, %v3292_v34  ;;  %v2907_v35 = vsel %vm2794_vm5, %v2871_v47, 0.0 }
 0x1dc   : > { %v2571_v31 = vadd.f32 %v2470_v10, %v2362_v2  ;;  %v2367_v7 = vadd.f32 %v3726_v3, %v5010_v28  ;;  %v2808_v1 = vsel %vm2794_vm5, %v2608_v52, 0.0  ;;  %v2807_v8 = vadd.f32 %v2806_v53, %v2805_v45 }
 0x1dd   : > { %v3761_v14 = vpop.f32.mrf.mxu0  ;;  %v2274_v18 = vpop.f32.mrf.mxu1  ;;  %v2908_v24 = vadd.f32 %v2907_v35, %v2906_v32  ;;  %v3297_v33 = vpack.c.bf16 %v2611_v15, %v2611_v15  ;;  %v2911_v13 = vsel %vm2794_vm5, %v2873_v55, 0.0  ;;  %v2814_v48 = vsel %vm2794_vm5, %v2611_v15, 0.0 }
 0x1de   : > { %v3295_v44 = vpack.c.bf16 %v2609_v17, %v2609_v17  ;;  %v2874_v40 = vmul.f32 %v2609_v17, %v2609_v17  ;;  %v2809_v10 = vadd.f32 %v2808_v1, %v2807_v8  ;;  %v2612_v28 = vadd.f32 %v5082_v58, %v2573_v19 }
 0x1df   : > { %v2486_v54 = vpop.f32.mrf.mxu0  ;;  %v3727_v57 = vpop.f32.mrf.mxu1  ;;  %v2910_v37 = vadd.f32 %v2909_v39, %v2908_v24  ;;  %2772 = vst.msk [vmem:[%s5097_s24 + $0x28] sm:$0xf] %vm2761_vm4, %v3297_v33  ;;  %v2610_v52 = vadd.f32 %v5082_v58, %v2571_v31  ;;  %v2876_v6 = vmul.f32 %v2611_v15, %v2611_v15  ;;  %v2810_v51 = vsel %vm2794_vm5, %v2609_v17, 0.0 }
 0x1e0   : > { %2770 = vst.msk [vmem:[%s5097_s24 + $0x20] sm:$0xf] %vm2761_vm4, %v3295_v44  ;;  %v2576_v41 = vadd.f32 %v3760_v56, %v2367_v7  ;;  %v2365_v23 = vadd.f32 %v2274_v18, %v5013_v11  ;;  %v2811_v63 = vadd.f32 %v2810_v51, %v2809_v10  ;;  %v2913_v53 = vsel %vm2794_vm5, %v2874_v40, 0.0 }
 0x1e1   : > { %v3764_v4 = vpop.f32.mrf.mxu0  ;;  %v2277_v49 = vpop.f32.mrf.mxu1  ;;  %v2912_v22 = vadd.f32 %v2911_v13, %v2910_v37  ;;  %v3298_v32 = vpack.c.bf16 %v2612_v28, %v2612_v28  ;;  %v2877_v26 = vmul.f32 %v2612_v28, %v2612_v28  ;;  %v3296_v2 = vpack.c.bf16 %v2610_v52, %v2610_v52 }
 0x1e2   : > { %v2812_v55 = vsel %vm2794_vm5, %v2610_v52, 0.0  ;;  %v2875_v34 = vmul.f32 %v2610_v52, %v2610_v52  ;;  %v2615_v11 = vadd.f32 %v5082_v58, %v2576_v41  ;;  %v2574_v3 = vadd.f32 %v2483_v61, %v2365_v23 }
 0x1e3   : > { %v2499_v60 = vpop.f32.mrf.mxu0  ;;  %v3730_v20 = vpop.f32.mrf.mxu1  ;;  %v2914_v47 = vadd.f32 %v2913_v53, %v2912_v22  ;;  %2773 = vst.msk [vmem:[%s5097_s24 + $0x2c] sm:$0xf] %vm2761_vm4, %v3298_v32  ;;  %v2813_v56 = vadd.f32 %v2812_v55, %v2811_v63  ;;  %v2917_v15 = vsel %vm2794_vm5, %v2876_v6, 0.0  ;;  %2771 = vst.msk [vmem:[%s5097_s24 + $0x24] sm:$0xf] %vm2761_vm4, %v3296_v2  ;;  %v2368_v19 = vadd.f32 %v3727_v57, %v5016_v0 }
 0x1e4   : > { %v2915_v17 = vsel %vm2794_vm5, %v2875_v34, 0.0  ;;  %v2366_v39 = vadd.f32 %v2277_v49, %v5019_v27  ;;  %v2816_v31 = vsel %vm2794_vm5, %v2612_v28, 0.0  ;;  %v3301_v1 = vpack.c.bf16 %v2615_v11, %v2615_v11 }
 0x1e5   : > { %v3765_v45 = vpop.f32.mrf.mxu0  ;;  %v2290_v35 = vpop.f32.mrf.mxu1  ;;  %v2815_v7 = vadd.f32 %v2814_v48, %v2813_v56  ;;  %v2916_v18 = vadd.f32 %v2915_v17, %v2914_v47  ;;  %v2919_v61 = vsel %vm2794_vm5, %v2877_v26, 0.0  ;;  %v2613_v24 = vadd.f32 %v5082_v58, %v2574_v3 }
 0x1e6   : > { %v2577_v33 = vadd.f32 %v3761_v14, %v2368_v19  ;;  %v2575_v13 = vadd.f32 %v2486_v54, %v2366_v39  ;;  %2776 = vst.msk [vmem:[%s5097_s24 + $0x38] sm:$0xf] %vm2761_vm4, %v3301_v1  ;;  %v2371_v27 = vadd.f32 %v3730_v20, %v5022_v46  ;;  %v2369_v48 = vadd.f32 %v2290_v35, %v5025_v25 }
 0x1e7   : > { %v5176_v8 = vpop.f32.mrf.mxu0  ;;  %v3731_v44 = vpop.f32.mrf.mxu1  ;;  %v2918_v40 = vadd.f32 %v2917_v15, %v2916_v18  ;;  %v2817_v0 = vadd.f32 %v2816_v31, %v2815_v7  ;;  %v2880_v37 = vmul.f32 %v2615_v11, %v2615_v11  ;;  %v3299_v10 = vpack.c.bf16 %v2613_v24, %v2613_v24 }
 0x1e8   : > { %v2818_v28 = vsel %vm2794_vm5, %v2613_v24, 0.0  ;;  %v2878_v52 = vmul.f32 %v2613_v24, %v2613_v24  ;;  %v2616_v54 = vadd.f32 %v5082_v58, %v2577_v33  ;;  %v2614_v41 = vadd.f32 %v5082_v58, %v2575_v13 }
 0x1e9   : > { %v3768_v57 = vpop.f32.mrf.mxu0  ;;  %v2293_v6 = vpop.f32.mrf.mxu1  ;;  %v2819_v51 = vadd.f32 %v2818_v28, %v2817_v0  ;;  %v2920_v14 = vadd.f32 %v2919_v61, %v2918_v40  ;;  %2774 = vst.msk [vmem:[%s5097_s24 + $0x30] sm:$0xf] %vm2761_vm4, %v3299_v10  ;;  %v2580_v25 = vadd.f32 %v3764_v4, %v2371_v27  ;;  %v2578_v49 = vadd.f32 %v2499_v60, %v2369_v48 }
 0x1ea   : > { %v2921_v46 = vsel %vm2794_vm5, %v2878_v52, 0.0  ;;  %v2372_v63 = vadd.f32 %v3731_v44, %v5028_v9  ;;  %v3302_v32 = vpack.c.bf16 %v2616_v54, %v2616_v54  ;;  %v3300_v2 = vpack.c.bf16 %v2614_v41, %v2614_v41 }
 0x1eb   : > { %v2515_v23 = vpop.f32.mrf.mxu0  ;;  %v3734_v22 = vpop.f32.mrf.mxu1  ;;  %v2922_v53 = vadd.f32 %v2921_v46, %v2920_v14  ;;  %v2820_v55 = vsel %vm2794_vm5, %v2614_v41, 0.0  ;;  %v2879_v34 = vmul.f32 %v2614_v41, %v2614_v41  ;;  %v2619_v20 = vadd.f32 %v5082_v58, %v2580_v25 }
 0x1ec   : > { %v2822_v56 = vsel %vm2794_vm5, %v2615_v11, 0.0  ;;  %2777 = vst.msk [vmem:[%s5097_s24 + $0x3c] sm:$0xf] %vm2761_vm4, %v3302_v32  ;;  %v2821_v4 = vadd.f32 %v2820_v55, %v2819_v51  ;;  %v2617_v9 = vadd.f32 %v5082_v58, %v2578_v49  ;;  %v2581_v60 = vadd.f32 %v3765_v45, %v2372_v63  ;;  %2775 = vst.msk [vmem:[%s5097_s24 + $0x34] sm:$0xf] %vm2761_vm4, %v3300_v2 }
 0x1ed   : > { %v3769_v26 = vpop.f32.mrf.mxu0  ;;  %v2306_v47 = vpop.f32.mrf.mxu1  ;;  %v2925_v15 = vsel %vm2794_vm5, %v2880_v37, 0.0  ;;  %v2881_v17 = vmul.f32 %v2616_v54, %v2616_v54  ;;  %v2923_v19 = vsel %vm2794_vm5, %v2879_v34, 0.0  ;;  %v3305_v39 = vpack.c.bf16 %v2619_v20, %v2619_v20 }
 0x1ee   : > { %v2824_v11 = vsel %vm2794_vm5, %v2616_v54, 0.0  ;;  %v2823_v31 = vadd.f32 %v2822_v56, %v2821_v4  ;;  %v2924_v7 = vadd.f32 %v2923_v19, %v2922_v53  ;;  %v3303_v18 = vpack.c.bf16 %v2617_v9, %v2617_v9 }
 0x1ef   : > { %v2518_v3 = vpop.f32.mrf.mxu0  ;;  %v3735_v35 = vpop.f32.mrf.mxu1  ;;  %2780 = vst.msk [vmem:[%s5097_s24 + $0x48] sm:$0xf] %vm2761_vm4, %v3305_v39  ;;  %v2884_v45 = vmul.f32 %v2619_v20, %v2619_v20  ;;  %v2882_v61 = vmul.f32 %v2617_v9, %v2617_v9  ;;  %v2620_v24 = vadd.f32 %v5082_v58, %v2581_v60  ;;  %v2370_v33 = vadd.f32 %v2293_v6, %v5031_v59 }
 0x1f0   : > { %v2926_v44 = vadd.f32 %v2925_v15, %v2924_v7  ;;  %2778 = vst.msk [vmem:[%s5097_s24 + $0x40] sm:$0xf] %vm2761_vm4, %v3303_v18  ;;  %v2825_v40 = vadd.f32 %v2824_v11, %v2823_v31  ;;  %v2375_v0 = vadd.f32 %v3734_v22, %v5034_v50  ;;  %v2373_v27 = vadd.f32 %v2306_v47, %v5037_v29 }
 0x1f1   : > { %v5202_v1 = vpop.f32.mrf.mxu0  ;;  %v2309_v13 = vpop.f32.mrf.mxu1  ;;  %v2927_v37 = vsel %vm2794_vm5, %v2881_v17, 0.0  ;;  %v2830_v10 = vsel %vm2794_vm5, %v2619_v20, 0.0  ;;  %v2826_v28 = vsel %vm2794_vm5, %v2617_v9, 0.0  ;;  %v3306_v52 = vpack.c.bf16 %v2620_v24, %v2620_v24 }
 0x1f2   : > { %v2827_v59 = vadd.f32 %v2826_v28, %v2825_v40  ;;  %v2928_v6 = vadd.f32 %v2927_v37, %v2926_v44  ;;  %v2579_v14 = vadd.f32 %v5176_v8, %v2370_v33  ;;  %v2584_v54 = vadd.f32 %v3768_v57, %v2375_v0 }
 0x1f3   : > { %v2531_v48 = vpop.f32.mrf.mxu0  ;;  %v3738_v51 = vpop.f32.mrf.mxu1  ;;  %v2929_v41 = vsel %vm2794_vm5, %v2882_v61, 0.0  ;;  %2781 = vst.msk [vmem:[%s5097_s24 + $0x4c] sm:$0xf] %vm2761_vm4, %v3306_v52  ;;  %v2582_v50 = vadd.f32 %v2515_v23, %v2373_v27  ;;  %v2376_v29 = vadd.f32 %v3735_v35, %v5040_v62  ;;  %v2374_v46 = vadd.f32 %v2309_v13, %v5043_v16 }
 0x1f4   : > { %v2933_v49 = vsel %vm2794_vm5, %v2884_v45, 0.0  ;;  %v2930_v63 = vadd.f32 %v2929_v41, %v2928_v6  ;;  %v2618_v22 = vadd.f32 %v5082_v58, %v2579_v14  ;;  %v2623_v53 = vadd.f32 %v5082_v58, %v2584_v54 }
 0x1f5   : > { %v2322_v25 = vpop.f32.mrf.mxu1  ;;  %v3773_v8 = vpop.f32.mrf.mxu0  ;;  %v2885_v57 = vmul.f32 %v2620_v24, %v2620_v24  ;;  %v2621_v32 = vadd.f32 %v5082_v58, %v2582_v50  ;;  %v2585_v2 = vadd.f32 %v3769_v26, %v2376_v29  ;;  %v2583_v23 = vadd.f32 %v2518_v3, %v2374_v46 }
 0x1f6   : > { %v3304_v62 = vpack.c.bf16 %v2618_v22, %v2618_v22  ;;  %v2828_v16 = vsel %vm2794_vm5, %v2618_v22, 0.0  ;;  %v2883_v34 = vmul.f32 %v2618_v22, %v2618_v22  ;;  %v3309_v20 = vpack.c.bf16 %v2623_v53, %v2623_v53 }
 0x1f7   : > { %v3739_v55 = vpop.f32.mrf.mxu1  ;;  %v2832_v47 = vsel %vm2794_vm5, %v2620_v24, 0.0  ;;  %v2829_v56 = vadd.f32 %v2828_v16, %v2827_v59  ;;  %v3307_v4 = vpack.c.bf16 %v2621_v32, %v2621_v32  ;;  %v2379_v9 = vadd.f32 %v3738_v51, %v5046_v12  ;;  %v2534_v19 = vpop.f32.mrf.mxu0 }
 0x1f8   : > { %2779 = vst.msk [vmem:[%s5097_s24 + $0x44] sm:$0xf] %vm2761_vm4, %v3304_v62  ;;  %v2931_v15 = vsel %vm2794_vm5, %v2883_v34, 0.0  ;;  %2784 = vst.msk [vmem:[%s5097_s24 + $0x58] sm:$0xf] %vm2761_vm4, %v3309_v20  ;;  %v2886_v26 = vmul.f32 %v2621_v32, %v2621_v32  ;;  %v2624_v3 = vadd.f32 %v5082_v58, %v2585_v2  ;;  %v2377_v17 = vadd.f32 %v2322_v25, %v5049_v36 }
 0x1f9   : > { %v2325_v60 = vpop.f32.mrf.mxu1  ;;  %v2935_v39 = vsel %vm2794_vm5, %v2885_v57, 0.0  ;;  %v2831_v35 = vadd.f32 %v2830_v10, %v2829_v56  ;;  %v2932_v11 = vadd.f32 %v2931_v15, %v2930_v63  ;;  %2782 = vst.msk [vmem:[%s5097_s24 + $0x50] sm:$0xf] %vm2761_vm4, %v3307_v4  ;;  %v2622_v12 = vadd.f32 %v5082_v58, %v2583_v23  ;;  %v3776_v37 = vpop.f32.mrf.mxu0 }
 0x1fa   : > { %v2888_v7 = vmul.f32 %v2623_v53, %v2623_v53  ;;  %v2834_v18 = vsel %vm2794_vm5, %v2621_v32, 0.0  ;;  %v2937_v45 = vsel %vm2794_vm5, %v2886_v26, 0.0  ;;  %v3310_v61 = vpack.c.bf16 %v2624_v3, %v2624_v3 }
 0x1fb   : > { %v3742_v31 = vpop.f32.mrf.mxu1  ;;  %v2934_v24 = vadd.f32 %v2933_v49, %v2932_v11  ;;  %v2833_v36 = vadd.f32 %v2832_v47, %v2831_v35  ;;  %v2889_v33 = vmul.f32 %v2624_v3, %v2624_v3  ;;  %v3308_v13 = vpack.c.bf16 %v2622_v12, %v2622_v12  ;;  %v2547_v49 = vpop.f32.mrf.mxu0 }
 0x1fc   : > { %2785 = vst.msk [vmem:[%s5097_s24 + $0x5c] sm:$0xf] %vm2761_vm4, %v3310_v61  ;;  %v2836_v44 = vsel %vm2794_vm5, %v2622_v12, 0.0  ;;  %v2887_v40 = vmul.f32 %v2622_v12, %v2622_v12  ;;  %v2588_v0 = vadd.f32 %v5202_v1, %v2379_v9  ;;  %v2586_v27 = vadd.f32 %v2531_v48, %v2377_v17 }
 0x1fd   : > { %v2338_v10 = vpop.f32.mrf.mxu1  ;;  %v2835_v28 = vadd.f32 %v2834_v18, %v2833_v36  ;;  %v2936_v52 = vadd.f32 %v2935_v39, %v2934_v24  ;;  %2783 = vst.msk [vmem:[%s5097_s24 + $0x54] sm:$0xf] %vm2761_vm4, %v3308_v13  ;;  %v2380_v51 = vadd.f32 %v3739_v55, %v5052_v43  ;;  %v2378_v59 = vadd.f32 %v2325_v60, %v5055_v38  ;;  %v3777_v4 = vpop.f32.mrf.mxu0 }
 0x1fe   : > { %v2939_v6 = vsel %vm2794_vm5, %v2887_v40, 0.0  ;;  %v2627_v14 = vadd.f32 %v5082_v58, %v2588_v0  ;;  %v2625_v54 = vadd.f32 %v5082_v58, %v2586_v27  ;;  %v2383_v1 = vadd.f32 %v3742_v31, %v5060_v30 }
 0x1ff   : > { %v2938_v48 = vadd.f32 %v2937_v45, %v2936_v52  ;;  %v2837_v41 = vadd.f32 %v2836_v44, %v2835_v28  ;;  %v2589_v50 = vadd.f32 %v3773_v8, %v2380_v51  ;;  %v2587_v29 = vadd.f32 %v2534_v19, %v2378_v59  ;;  %v3743_v38 = vpop.f32.mrf.mxu1  ;;  %v2550_v24 = vpop.f32.mrf.mxu0 }
 0x200   : > { %v2838_v46 = vsel %vm2794_vm5, %v2623_v53, 0.0  ;;  %v3313_v25 = vpack.c.bf16 %v2627_v14, %v2627_v14  ;;  %v3311_v43 = vpack.c.bf16 %v2625_v54, %v2625_v54  ;;  %v2941_v63 = vsel %vm2794_vm5, %v2888_v7, 0.0 }
 0x201   : > { %v2840_v22 = vsel %vm2794_vm5, %v2624_v3, 0.0  ;;  %v2839_v57 = vadd.f32 %v2838_v46, %v2837_v41  ;;  %v2940_v32 = vadd.f32 %v2939_v6, %v2938_v48  ;;  %v2890_v30 = vmul.f32 %v2625_v54, %v2625_v54  ;;  %v2341_v9 = vpop.f32.mrf.mxu1 }
 0x202   : > { %2788 = vst.msk [vmem:[%s5097_s24 + $0x68] sm:$0xf] %vm2761_vm4, %v3313_v25  ;;  %2786 = vst.msk [vmem:[%s5097_s24 + $0x60] sm:$0xf] %vm2761_vm4, %v3311_v43  ;;  %v2628_v8 = vadd.f32 %v5082_v58, %v2589_v50  ;;  %v2626_v2 = vadd.f32 %v5082_v58, %v2587_v29  ;;  %v2592_v53 = vadd.f32 %v3776_v37, %v2383_v1  ;;  %v2943_v23 = vsel %vm2794_vm5, %v2889_v33, 0.0 }
 0x203   : > { %v2942_v55 = vadd.f32 %v2941_v63, %v2940_v32  ;;  %v2841_v62 = vadd.f32 %v2840_v22, %v2839_v57  ;;  %v2381_v16 = vadd.f32 %v2338_v10, %v5065_v42  ;;  %v2892_v34 = vmul.f32 %v2627_v14, %v2627_v14 }
 0x204   : > { %v2842_v20 = vsel %vm2794_vm5, %v2625_v54, 0.0  ;;  %v3314_v47 = vpack.c.bf16 %v2628_v8, %v2628_v8  ;;  %v3312_v56 = vpack.c.bf16 %v2626_v2, %v2626_v2  ;;  %v2844_v26 = vsel %vm2794_vm5, %v2626_v2, 0.0 }
 0x205   : > { %v2843_v60 = vadd.f32 %v2842_v20, %v2841_v62  ;;  %v2944_v15 = vadd.f32 %v2943_v23, %v2942_v55  ;;  %v2891_v3 = vmul.f32 %v2626_v2, %v2626_v2  ;;  %v2945_v17 = vsel %vm2794_vm5, %v2890_v30, 0.0 }
 0x206   : > { %2789 = vst.msk [vmem:[%s5097_s24 + $0x6c] sm:$0xf] %vm2761_vm4, %v3314_v47  ;;  %2787 = vst.msk [vmem:[%s5097_s24 + $0x64] sm:$0xf] %vm2761_vm4, %v3312_v56  ;;  %v2631_v42 = vadd.f32 %v5082_v58, %v2592_v53  ;;  %v2590_v19 = vadd.f32 %v2547_v49, %v2381_v16  ;;  %v2384_v39 = vadd.f32 %v3743_v38, %v5071_v5  ;;  %v2846_v7 = vsel %vm2794_vm5, %v2627_v14, 0.0 }
 0x207   : > { %v2946_v35 = vadd.f32 %v2945_v17, %v2944_v15  ;;  %v2845_v11 = vadd.f32 %v2844_v26, %v2843_v60  ;;  %v2947_v12 = vsel %vm2794_vm5, %v2891_v3, 0.0  ;;  %v2382_v31 = vadd.f32 %v2341_v9, %v5075_v21 }
 0x208   : > { %v2893_v18 = vmul.f32 %v2628_v8, %v2628_v8  ;;  %v3317_v45 = vpack.c.bf16 %v2631_v42, %v2631_v42  ;;  %v2629_v61 = vadd.f32 %v5082_v58, %v2590_v19  ;;  %v2593_v13 = vadd.f32 %v3777_v4, %v2384_v39 }
 0x209   : > { %v2847_v36 = vadd.f32 %v2846_v7, %v2845_v11  ;;  %v2948_v33 = vadd.f32 %v2947_v12, %v2946_v35  ;;  %v2591_v44 = vadd.f32 %v2550_v24, %v2382_v31  ;;  %v2949_v5 = vsel %vm2794_vm5, %v2892_v34, 0.0 }
 0x20a   : > { %v2848_v40 = vsel %vm2794_vm5, %v2628_v8, 0.0  ;;  %2792 = vst.msk [vmem:[%s5097_s24 + $0x78] sm:$0xf] %vm2761_vm4, %v3317_v45  ;;  %v3315_v0 = vpack.c.bf16 %v2629_v61, %v2629_v61  ;;  %v2894_v21 = vmul.f32 %v2629_v61, %v2629_v61  ;;  %v2632_v10 = vadd.f32 %v5082_v58, %v2593_v13 }
 0x20b   : > { %v2950_v27 = vadd.f32 %v2949_v5, %v2948_v33  ;;  %v2849_v37 = vadd.f32 %v2848_v40, %v2847_v36  ;;  %v2630_v28 = vadd.f32 %v5082_v58, %v2591_v44  ;;  %v2951_v52 = vsel %vm2794_vm5, %v2893_v18, 0.0 }
 0x20c   : > { %2790 = vst.msk [vmem:[%s5097_s24 + $0x70] sm:$0xf] %vm2761_vm4, %v3315_v0  ;;  %v2850_v51 = vsel %vm2794_vm5, %v2629_v61, 0.0  ;;  %v2896_v59 = vmul.f32 %v2631_v42, %v2631_v42  ;;  %v3318_v54 = vpack.c.bf16 %v2632_v10, %v2632_v10  ;;  %v2953_v1 = vsel %vm2794_vm5, %v2894_v21, 0.0 }
 0x20d   : > { %v2851_v6 = vadd.f32 %v2850_v51, %v2849_v37  ;;  %v2952_v14 = vadd.f32 %v2951_v52, %v2950_v27  ;;  %v3316_v48 = vpack.c.bf16 %v2630_v28, %v2630_v28  ;;  %v2852_v41 = vsel %vm2794_vm5, %v2630_v28, 0.0 }
 0x20e   : > { %v2895_v50 = vmul.f32 %v2630_v28, %v2630_v28  ;;  %2793 = vst.msk [vmem:[%s5097_s24 + $0x7c] sm:$0xf] %vm2761_vm4, %v3318_v54  ;;  %v2854_v46 = vsel %vm2794_vm5, %v2631_v42, 0.0  ;;  %v2897_v25 = vmul.f32 %v2632_v10, %v2632_v10  ;;  %v2957_v63 = vsel %vm2794_vm5, %v2896_v59, 0.0 }
 0x20f   : > { %v2954_v29 = vadd.f32 %v2953_v1, %v2952_v14  ;;  %v2853_v58 = vadd.f32 %v2852_v41, %v2851_v6  ;;  %2791 = vst.msk [vmem:[%s5097_s24 + $0x74] sm:$0xf] %vm2761_vm4, %v3316_v48  ;;  %v2856_v22 = vsel %vm2794_vm5, %v2632_v10, 0.0 }
 0x210   : > { %v2955_v43 = vsel %vm2794_vm5, %v2895_v50, 0.0  ;;  %v2959_v30 = vsel %vm2794_vm5, %v2897_v25, 0.0 }
 0x211   : > { %v2855_v49 = vadd.f32 %v2854_v46, %v2853_v58  ;;  %v2956_v38 = vadd.f32 %v2955_v43, %v2954_v29 }
 0x213   : > { %v2857_v57 = vadd.f32 %v2856_v22, %v2855_v49  ;;  %v2958_v32 = vadd.f32 %v2957_v63, %v2956_v38 }
 0x215   : > { %v2858_v8 = vrot.slane %v2857_v57, 4  ;;  %v2960_v2 = vadd.f32 %v2959_v30, %v2958_v32 }
 0x217   : > { %v2859_v53 = vadd.f32 %v2858_v8, %v2857_v57  ;;  %v2961_v23 = vrot.slane %v2960_v2, 4 }
 0x219   : > { %v2860_v55 = vrot.slane %v2859_v53, 2  ;;  %v2962_v62 = vadd.f32 %v2961_v23, %v2960_v2 }
 0x21b   : > { %v2861_v16 = vadd.f32 %v2860_v55, %v2859_v53  ;;  %v2963_v34 = vrot.slane %v2962_v62, 2 }
 0x21d   : > { %v2862_v20 = vrot.slane %v2861_v16, 1  ;;  %v2964_v47 = vadd.f32 %v2963_v34, %v2962_v62 }
 0x21f   : > { %v2863_v56 = vadd.f32 %v2862_v20, %v2861_v16  ;;  %v2965_v4 = vrot.slane %v2964_v47, 1 }
 0x221   : > { %2865 = vst.msk [vmem:[%s238_s27] sm:$0x1] %vm2864_vm6, %v2863_v56  ;;  %v2966_v9 = vadd.f32 %v2965_v4, %v2964_v47 }
 0x223   : > { %2967 = vst.msk [vmem:[%s241_s30] sm:$0x1] %vm2864_vm6, %v2966_v9 }
 0x224 PF: > { %s16_s18 = sadd.s32 1, %s3841_s18  }
 0x225   : > { %p13_p4 = scmp.ge.s32.totalorder %s16_s18, 4  }
 0x227   :  { %15 = sbr.rel (!%p13_p4) target bundleno = 1 (0x1), region = 94 }

</bundles_post_ra>
